<compile_context>
chip_gen: v7x
topology: tpu7x:2x2x1
jax: 0.10.0
libtpu: 0.0.40
codegen_flags: <defaults>
</compile_context>

<pallas_src>
import functools

import jax
import jax.numpy as jnp
from jax.experimental import pallas as pl
from jax.experimental.pallas import tpu as pltpu

# Full f32 precision for every matmul (kernel trace AND pure-JAX reference):
# guarantees the multi-hot "gather" matmul passes embedding values through
# (numerically) exactly and keeps the reference comparison apples-to-apples.
jax.config.update("jax_default_matmul_precision", "highest")

MF_DIM = 358
EMBED_DIM = 3
HIDDEN = 20


def _round_up(n, m):
    return -(-n // m) * m


# ---------------------------------------------------------------------------
# Fused Pallas kernel: embedding gather + concat + classifier MLP
# ---------------------------------------------------------------------------
def _fused_kernel(mf_ref, nla_ref, comp_ref, embc_ref, w1mf_ref, slab_ref,
                  emb_out_ref, pred_ref, *, n_col, e_dim, row_offsets, emb_pad):
    mf = mf_ref[...]                      # (TB, 358) f32
    nla = nla_ref[...]                    # (TB, 1)   f32
    comp = comp_ref[...]                  # (TB, n_col) int32

    tb = mf.shape[0]
    n_rows = embc_ref.shape[0]

    # Multi-hot row-selection matrix: one 1 per embedding column, in disjoint
    # row blocks.  multi_hot @ [blockdiag(tables) | blockdiag(tables) @ W1_emb]
    # == [concat of gathers | their hidden-layer contribution].
    row_ids = jax.lax.broadcasted_iota(jnp.int32, (tb, n_rows), 1)
    onehots = []
    for i in range(n_col):
        idx = comp[:, i:i + 1] + row_offsets[i]            # (TB, 1)
        onehots.append((row_ids == idx).astype(jnp.float32))
    # Pairwise (tree) sum: shorter VALU dependency chain than a serial chain.
    while len(onehots) > 1:
        nxt = [onehots[j] + onehots[j + 1] for j in range(0, len(onehots) - 1, 2)]
        if len(onehots) % 2:
            nxt.append(onehots[-1])
        onehots = nxt
    multi_hot = onehots[0]                                  # (TB, n_rows)

    combined = jnp.dot(multi_hot, embc_ref[...],
                       preferred_element_type=jnp.float32)  # (TB, emb_pad+20)
    emb_cat = combined[:, 0:n_col * e_dim]                  # gathered embeddings
    h_emb = combined[:, emb_pad:emb_pad + HIDDEN]           # emb @ W1_emb (lane-aligned)

    # Concatenated feature output: [meta_features | nla | embeddings].
    # Single coalesced store for the misaligned 16-column tail.
    emb_out_ref[:, 0:MF_DIM] = mf
    emb_out_ref[:, MF_DIM:MF_DIM + 1 + n_col * e_dim] = jnp.concatenate(
        [nla, emb_cat], axis=1)

    # Packed tiny params: row0=W1_nla, row1=b1, row2=W2ᵀ, row3=[b2, 0...].
    w1nla = slab_ref[0:1, :]
    b1 = slab_ref[1:2, :]
    w2 = slab_ref[2:3, :]
    b2 = slab_ref[3:4, 0:1]

    # Classifier.  x @ W1 == mf @ W1_mf + nla * W1_nla + emb_cat @ W1_emb,
    # with the last term already produced by the fused multi-hot matmul.
    h = jnp.dot(mf, w1mf_ref[...], preferred_element_type=jnp.float32)
    h = jnp.maximum(h + nla * w1nla + h_emb + b1, 0.0)      # (TB, 20), ReLU
    # Second layer (20 -> 1) computed directly in lane-dense row form.
    y = jnp.einsum('oh,bh->ob', w2, h) + b2                 # (1, TB)
    pred_ref[...] = jax.nn.sigmoid(y).reshape(pred_ref.shape)


# ---------------------------------------------------------------------------
# Parameter construction (deterministic, synthetic — no checkpoint load)
# ---------------------------------------------------------------------------
def init_params(key, n_col, n_per_col, embedding_dim=EMBED_DIM):
    keys = jax.random.split(key, n_col + 4)
    emb_tables = [
        jax.random.normal(keys[i], (int(n_per_col[i]), embedding_dim), jnp.float32)
        for i in range(n_col)
    ]
    d_in = MF_DIM + 1 + n_col * embedding_dim
    lim1 = 1.0 / jnp.sqrt(d_in)
    lim2 = 1.0 / jnp.sqrt(HIDDEN)
    w1 = jax.random.uniform(keys[n_col + 0], (d_in, HIDDEN), jnp.float32, -lim1, lim1)
    b1 = jax.random.uniform(keys[n_col + 1], (1, HIDDEN), jnp.float32, -lim1, lim1)
    w2 = jax.random.uniform(keys[n_col + 2], (HIDDEN, 1), jnp.float32, -lim2, lim2)
    b2 = jax.random.uniform(keys[n_col + 3], (1, 1), jnp.float32, -lim2, lim2)
    return {"emb": emb_tables, "w1": w1, "b1": b1, "w2": w2, "b2": b2}


def _choose_tile(batch):
    """Batch tile size.

    Small batches: one sublane-rounded tile (no padding waste).
    Large batches: big tiles (amortize per-grid-step overhead) while keeping
    >= 2 grid steps so the "parallel" axis shards across v7x's 2 TensorCores.
    TB is capped at 1024 so double-buffered blocks (~6 MB) stay far below the
    scoped-VMEM default on every generation (v5e 16 MiB included).
    """
    if batch <= 16:
        return _round_up(max(batch, 1), 8)
    return min(1024, _round_up(pl.cdiv(batch, 2), 8))


# ---------------------------------------------------------------------------
# Forward pass (matches meta_predictor.forward semantics)
# ---------------------------------------------------------------------------
def meta_predictor_forward(params, meta_features, nla, components):
    emb_tables = params["emb"]
    n_col = len(emb_tables)
    assert components.shape[1] == n_col
    e_dim = emb_tables[0].shape[1]
    d_in = MF_DIM + 1 + n_col * e_dim
    emb_cols = n_col * e_dim
    emb_pad = max(128, _round_up(emb_cols, 128))   # lane-aligned split point

    # --- pack params for the kernel (tiny, parameter-only reshuffles) ---
    blocks, offsets, acc = [], [], 0
    for i, tbl in enumerate(emb_tables):
        blk = jnp.zeros((tbl.shape[0], emb_cols), jnp.float32)
        blk = blk.at[:, i * e_dim:(i + 1) * e_dim].set(tbl.astype(jnp.float32))
        blocks.append(blk)
        offsets.append(acc)
        acc += tbl.shape[0]
    emb_stack = jnp.concatenate(blocks, axis=0)             # (R, emb_cols) block-diag
    n_rows = emb_stack.shape[0]

    w1 = params["w1"].astype(jnp.float32)                   # (374, 20)
    w1_mf = w1[:MF_DIM]                                     # (358, 20)
    w1_nla = w1[MF_DIM:MF_DIM + 1]                          # (1, 20)
    w1_emb = w1[MF_DIM + 1:]                                # (emb_cols, 20)
    b1 = params["b1"].reshape(1, HIDDEN).astype(jnp.float32)
    w2_row = params["w2"].reshape(1, HIDDEN).astype(jnp.float32)
    b2 = params["b2"].reshape(1, 1).astype(jnp.float32)

    # Fold W1_emb into the multi-hot matmul: [emb_stack (lane-padded) | emb_stack @ W1_emb].
    emb_combined = jnp.concatenate(
        [jnp.pad(emb_stack, ((0, 0), (0, emb_pad - emb_cols))),
         jnp.dot(emb_stack, w1_emb)], axis=1)               # (R, emb_pad + 20)

    # Pack the tiny per-row params into one resident (4, 20) slab.
    small_slab = jnp.concatenate(
        [w1_nla, b1, w2_row, jnp.pad(b2, ((0, 0), (0, HIDDEN - 1)))], axis=0)

    # --- batch tiling ---
    batch = meta_features.shape[0]
    tb = _choose_tile(batch)
    b_pad = _round_up(batch, tb)
    n_tiles = b_pad // tb

    mf = meta_features.astype(jnp.float32)
    nl = nla.astype(jnp.float32)
    comp = components.astype(jnp.int32)
    if b_pad != batch:
        pad = b_pad - batch
        mf = jnp.pad(mf, ((0, pad), (0, 0)))
        nl = jnp.pad(nl, ((0, pad), (0, 0)))
        comp = jnp.pad(comp, ((0, pad), (0, 0)))

    batch_map = lambda i: (i, 0)
    resident_map = lambda i: (0, 0)       # same block every step -> VMEM-resident
    kernel = functools.partial(_fused_kernel, n_col=n_col, e_dim=e_dim,
                               row_offsets=tuple(offsets), emb_pad=emb_pad)

    emb_out, pred_rows = pl.pallas_call(
        kernel,
        grid=(n_tiles,),
        in_specs=[
            pl.BlockSpec((tb, MF_DIM), batch_map),                 # meta_features
            pl.BlockSpec((tb, 1), batch_map),                      # nla
            pl.BlockSpec((tb, n_col), batch_map),                  # components
            pl.BlockSpec((n_rows, emb_pad + HIDDEN), resident_map),  # emb tables (+W1_emb)
            pl.BlockSpec((MF_DIM, HIDDEN), resident_map),          # W1[:358]
            pl.BlockSpec((4, HIDDEN), resident_map),               # [W1_nla; b1; W2; b2]
        ],
        out_specs=[
            pl.BlockSpec((tb, d_in), batch_map),                   # embedding output
            pl.BlockSpec((1, 1, tb), lambda i: (i, 0, 0)),         # pred (lane-dense row)
        ],
        out_shape=[
            jax.ShapeDtypeStruct((b_pad, d_in), jnp.float32),
            jax.ShapeDtypeStruct((n_tiles, 1, tb), jnp.float32),
        ],
        compiler_params=pltpu.CompilerParams(
            dimension_semantics=("parallel",)),
    )(mf, nl, comp, emb_combined, w1_mf, small_slab)

    pred = pred_rows.reshape(b_pad, 1)[:batch]
    return emb_out[:batch], pred


# ---------------------------------------------------------------------------
# Self-test
# ---------------------------------------------------------------------------
def _make_inputs(key, batch, n_col, n_per_col):
    k_mf, k_nla, k_comp = jax.random.split(key, 3)
    meta_features = jax.random.normal(k_mf, (batch, MF_DIM), jnp.float32)
    nla = jax.random.normal(k_nla, (batch, 1), jnp.float32)
    components = jnp.stack(
        [jax.random.randint(jax.random.fold_in(k_comp, i), (batch,), 0, n_per_col[i])
         for i in range(n_col)],
        axis=1,
    ).astype(jnp.int32)
    return meta_features, nla, components


def _reference(params, meta_features, nla, components):
    n_col = len(params["emb"])
    emb_ref = jnp.concatenate(
        [params["emb"][i][components[:, i]] for i in range(n_col)], axis=1)
    x_ref = jnp.concatenate([meta_features, nla, emb_ref], axis=1)
    h_ref = jnp.maximum(jnp.dot(x_ref, params["w1"]) + params["b1"], 0.0)
    pred_ref = jax.nn.sigmoid(jnp.dot(h_ref, params["w2"]) + params["b2"])
    return x_ref, pred_ref


if __name__ == "__main__":
    key = jax.random.PRNGKey(0)
    k_in_small, k_in_big, k_params = jax.random.split(key, 3)

    n_col = 5
    n_per_col = [6, 4, 8, 5, 7]
    params = init_params(k_params, n_col, n_per_col)
    d_in = MF_DIM + 1 + n_col * EMBED_DIM

    ok = True
    # Small batch (single tile) and a larger batch (multi-tile / lane-dense pred path).
    for k_in, B in ((k_in_small, 4), (k_in_big, 300)):
        meta_features, nla, components = _make_inputs(k_in, B, n_col, n_per_col)

        embedding, pred = meta_predictor_forward(params, meta_features, nla, components)
        jax.block_until_ready((embedding, pred))

        x_ref, pred_ref = _reference(params, meta_features, nla, components)

        assert embedding.shape == (B, d_in)
        assert pred.shape == (B, 1)
        ok &= bool(jnp.allclose(embedding, x_ref, atol=1e-5))
        ok &= bool(jnp.allclose(pred, pred_ref, atol=1e-5))
        ok &= bool(jnp.all((pred >= 0.0) & (pred <= 1.0)))

    assert ok
    print("KERNEL_OK")
</pallas_src>

<mosaic_0001>
module attributes {stable_mosaic.version = 11 : i64} {
  func.func @_fused_kernel(%arg0: i32, %arg1: memref<8x358xf32, #tpu.memory_space<vmem>>, %arg2: memref<8x1xf32, #tpu.memory_space<vmem>>, %arg3: memref<8x5xi32, #tpu.memory_space<vmem>>, %arg4: memref<30x148xf32, #tpu.memory_space<vmem>>, %arg5: memref<358x20xf32, #tpu.memory_space<vmem>>, %arg6: memref<4x20xf32, #tpu.memory_space<vmem>>, %arg7: memref<8x374xf32, #tpu.memory_space<vmem>>, %arg8: memref<1x1x8xf32, #tpu.memory_space<vmem>>) attributes {dimension_semantics = [#tpu.dimension_semantics<parallel>], iteration_bounds = array<i64: 1>, scalar_prefetch = 0 : i64, scratch_operands = 0 : i64, tpu.core_type = #tpu.core_type<tc>, window_params = [{transform_indices = @transform_0, window_bounds = array<i64: 8, 358>}, {transform_indices = @transform_1, window_bounds = array<i64: 8, 1>}, {transform_indices = @transform_2, window_bounds = array<i64: 8, 5>}, {pipeline_mode = #tpu.pipeline_mode<synchronous>, transform_indices = @transform_3, window_bounds = array<i64: 30, 148>}, {pipeline_mode = #tpu.pipeline_mode<synchronous>, transform_indices = @transform_4, window_bounds = array<i64: 358, 20>}, {pipeline_mode = #tpu.pipeline_mode<synchronous>, transform_indices = @transform_5, window_bounds = array<i64: 4, 20>}, {transform_indices = @transform_6, window_bounds = array<i64: 8, 374>}, {transform_indices = @transform_7, window_bounds = array<i64: 1, 1, 8>}]} {
    %c0 = arith.constant 0 : index
    %c0_0 = arith.constant 0 : index
    %0 = vector.load %arg1[%c0, %c0_0] : memref<8x358xf32, #tpu.memory_space<vmem>>, vector<8x358xf32>
    %c0_1 = arith.constant 0 : index
    %c0_2 = arith.constant 0 : index
    %1 = vector.load %arg2[%c0_1, %c0_2] : memref<8x1xf32, #tpu.memory_space<vmem>>, vector<8x1xf32>
    %c0_3 = arith.constant 0 : index
    %c0_4 = arith.constant 0 : index
    %2 = vector.load %arg3[%c0_3, %c0_4] : memref<8x5xi32, #tpu.memory_space<vmem>>, vector<8x5xi32>
    %3 = tpu.iota {dimensions = array<i32: 1>} : vector<8x30xi32>
    %4 = vector.extract_strided_slice %2 {offsets = [0, 0], sizes = [8, 1], strides = [1, 1]} : vector<8x5xi32> to vector<8x1xi32>
    %c0_i32 = arith.constant 0 : i32
    %5 = vector.broadcast %c0_i32 : i32 to vector<8x1xi32>
    %6 = arith.addi %4, %5 : vector<8x1xi32>
    %7 = vector.broadcast %6 : vector<8x1xi32> to vector<8x30xi32>
    %8 = arith.cmpi eq, %3, %7 : vector<8x30xi32>
    %9 = arith.extui %8 : vector<8x30xi1> to vector<8x30xi32>
    %10 = arith.sitofp %9 : vector<8x30xi32> to vector<8x30xf32>
    %11 = vector.extract_strided_slice %2 {offsets = [0, 1], sizes = [8, 1], strides = [1, 1]} : vector<8x5xi32> to vector<8x1xi32>
    %c6_i32 = arith.constant 6 : i32
    %12 = vector.broadcast %c6_i32 : i32 to vector<8x1xi32>
    %13 = arith.addi %11, %12 : vector<8x1xi32>
    %14 = vector.broadcast %13 : vector<8x1xi32> to vector<8x30xi32>
    %15 = arith.cmpi eq, %3, %14 : vector<8x30xi32>
    %16 = arith.extui %15 : vector<8x30xi1> to vector<8x30xi32>
    %17 = arith.sitofp %16 : vector<8x30xi32> to vector<8x30xf32>
    %18 = vector.extract_strided_slice %2 {offsets = [0, 2], sizes = [8, 1], strides = [1, 1]} : vector<8x5xi32> to vector<8x1xi32>
    %c10_i32 = arith.constant 10 : i32
    %19 = vector.broadcast %c10_i32 : i32 to vector<8x1xi32>
    %20 = arith.addi %18, %19 : vector<8x1xi32>
    %21 = vector.broadcast %20 : vector<8x1xi32> to vector<8x30xi32>
    %22 = arith.cmpi eq, %3, %21 : vector<8x30xi32>
    %23 = arith.extui %22 : vector<8x30xi1> to vector<8x30xi32>
    %24 = arith.sitofp %23 : vector<8x30xi32> to vector<8x30xf32>
    %25 = vector.extract_strided_slice %2 {offsets = [0, 3], sizes = [8, 1], strides = [1, 1]} : vector<8x5xi32> to vector<8x1xi32>
    %c18_i32 = arith.constant 18 : i32
    %26 = vector.broadcast %c18_i32 : i32 to vector<8x1xi32>
    %27 = arith.addi %25, %26 : vector<8x1xi32>
    %28 = vector.broadcast %27 : vector<8x1xi32> to vector<8x30xi32>
    %29 = arith.cmpi eq, %3, %28 : vector<8x30xi32>
    %30 = arith.extui %29 : vector<8x30xi1> to vector<8x30xi32>
    %31 = arith.sitofp %30 : vector<8x30xi32> to vector<8x30xf32>
    %32 = vector.extract_strided_slice %2 {offsets = [0, 4], sizes = [8, 1], strides = [1, 1]} : vector<8x5xi32> to vector<8x1xi32>
    %c23_i32 = arith.constant 23 : i32
    %33 = vector.broadcast %c23_i32 : i32 to vector<8x1xi32>
    %34 = arith.addi %32, %33 : vector<8x1xi32>
    %35 = vector.broadcast %34 : vector<8x1xi32> to vector<8x30xi32>
    %36 = arith.cmpi eq, %3, %35 : vector<8x30xi32>
    %37 = arith.extui %36 : vector<8x30xi1> to vector<8x30xi32>
    %38 = arith.sitofp %37 : vector<8x30xi32> to vector<8x30xf32>
    %39 = arith.addf %10, %17 : vector<8x30xf32>
    %40 = arith.addf %24, %31 : vector<8x30xf32>
    %41 = arith.addf %39, %40 : vector<8x30xf32>
    %42 = arith.addf %41, %38 : vector<8x30xf32>
    %c0_5 = arith.constant 0 : index
    %c0_6 = arith.constant 0 : index
    %43 = vector.load %arg4[%c0_5, %c0_6] : memref<30x148xf32, #tpu.memory_space<vmem>>, vector<30x148xf32>
    %cst = arith.constant dense<0.000000e+00> : vector<8x148xf32>
    %44 = tpu.matmul %42, %43, %cst {dimension_numbers = #tpu.dot_dimension_numbers<[1], [0], [0], [1], [0, 0, 1, 1], [], []>, precision = #tpu.contract_precision<fp32>} : vector<8x30xf32>, vector<30x148xf32>, vector<8x148xf32> -> vector<8x148xf32>
    %45 = vector.extract_strided_slice %44 {offsets = [0, 0], sizes = [8, 15], strides = [1, 1]} : vector<8x148xf32> to vector<8x15xf32>
    %46 = vector.extract_strided_slice %44 {offsets = [0, 128], sizes = [8, 20], strides = [1, 1]} : vector<8x148xf32> to vector<8x20xf32>
    %c0_7 = arith.constant 0 : index
    %c0_8 = arith.constant 0 : index
    %47 = vector.load %arg7[%c0_7, %c0_8] : memref<8x374xf32, #tpu.memory_space<vmem>>, vector<8x358xf32>
    tpu.vector_store %arg7[%c0_7, %c0_8], %0 {strides = array<i32>} : memref<8x374xf32, #tpu.memory_space<vmem>>, vector<8x358xf32>,
    %48 = tpu.concatenate %1, %45 in 1 : vector<8x1xf32>, vector<8x15xf32> -> vector<8x16xf32>
    %c0_9 = arith.constant 0 : index
    %c358 = arith.constant 358 : index
    %49 = vector.load %arg7[%c0_9, %c358] : memref<8x374xf32, #tpu.memory_space<vmem>>, vector<8x16xf32>
    tpu.vector_store %arg7[%c0_9, %c358], %48 {strides = array<i32>} : memref<8x374xf32, #tpu.memory_space<vmem>>, vector<8x16xf32>,
    %c0_10 = arith.constant 0 : index
    %c0_11 = arith.constant 0 : index
    %50 = vector.load %arg6[%c0_10, %c0_11] : memref<4x20xf32, #tpu.memory_space<vmem>>, vector<1x20xf32>
    %c1 = arith.constant 1 : index
    %c0_12 = arith.constant 0 : index
    %51 = vector.load %arg6[%c1, %c0_12] : memref<4x20xf32, #tpu.memory_space<vmem>>, vector<1x20xf32>
    %c2 = arith.constant 2 : index
    %c0_13 = arith.constant 0 : index
    %52 = vector.load %arg6[%c2, %c0_13] : memref<4x20xf32, #tpu.memory_space<vmem>>, vector<1x20xf32>
    %c3 = arith.constant 3 : index
    %c0_14 = arith.constant 0 : index
    %53 = vector.load %arg6[%c3, %c0_14] : memref<4x20xf32, #tpu.memory_space<vmem>>, vector<1x1xf32>
    %c0_15 = arith.constant 0 : index
    %c0_16 = arith.constant 0 : index
    %54 = vector.load %arg5[%c0_15, %c0_16] : memref<358x20xf32, #tpu.memory_space<vmem>>, vector<358x20xf32>
    %cst_17 = arith.constant dense<0.000000e+00> : vector<8x20xf32>
    %55 = tpu.matmul %0, %54, %cst_17 {dimension_numbers = #tpu.dot_dimension_numbers<[1], [0], [0], [1], [0, 0, 1, 1], [], []>, precision = #tpu.contract_precision<fp32>} : vector<8x358xf32>, vector<358x20xf32>, vector<8x20xf32> -> vector<8x20xf32>
    %56 = vector.broadcast %1 : vector<8x1xf32> to vector<8x20xf32>
    %57 = vector.broadcast %50 : vector<1x20xf32> to vector<8x20xf32>
    %58 = arith.mulf %56, %57 : vector<8x20xf32>
    %59 = arith.addf %55, %58 : vector<8x20xf32>
    %60 = arith.addf %59, %46 : vector<8x20xf32>
    %61 = vector.broadcast %51 : vector<1x20xf32> to vector<8x20xf32>
    %62 = arith.addf %60, %61 : vector<8x20xf32>
    %cst_18 = arith.constant 0.000000e+00 : f32
    %63 = vector.broadcast %cst_18 : f32 to vector<8x20xf32>
    %64 = arith.maximumf %62, %63 : vector<8x20xf32>
    "tpu.trace_start"() <{level = 10 : i32, message = "oh,bh->ob"}> : () -> ()
    %cst_19 = arith.constant dense<0.000000e+00> : vector<1x8xf32>
    %65 = tpu.matmul %52, %64, %cst_19 {dimension_numbers = #tpu.dot_dimension_numbers<[1], [1], [0], [0], [0, 0, 1, 0], [], []>, precision = #tpu.contract_precision<fp32>} : vector<1x20xf32>, vector<8x20xf32>, vector<1x8xf32> -> vector<1x8xf32>
    "tpu.trace_stop"() : () -> ()
    %66 = vector.broadcast %53 : vector<1x1xf32> to vector<1x8xf32>
    %67 = arith.addf %65, %66 : vector<1x8xf32>
    %68 = arith.negf %67 : vector<1x8xf32>
    %69 = math.exp %68 : vector<1x8xf32>
    %cst_20 = arith.constant 1.000000e+00 : f32
    %70 = vector.broadcast %cst_20 : f32 to vector<1x8xf32>
    %71 = arith.addf %70, %69 : vector<1x8xf32>
    %72 = arith.divf %70, %71 : vector<1x8xf32>
    %73 = vector.shape_cast %72 : vector<1x8xf32> to vector<1x1x8xf32>
    %c0_21 = arith.constant 0 : index
    %c0_22 = arith.constant 0 : index
    %c0_23 = arith.constant 0 : index
    %74 = vector.load %arg8[%c0_21, %c0_22, %c0_23] : memref<1x1x8xf32, #tpu.memory_space<vmem>>, vector<1x1x8xf32>
    tpu.vector_store %arg8[%c0_21, %c0_22, %c0_23], %73 {strides = array<i32>} : memref<1x1x8xf32, #tpu.memory_space<vmem>>, vector<1x1x8xf32>,
    return
  }
  func.func @transform_0(%arg0: i32) -> (i32, i32) {
    %c0_i32 = arith.constant 0 : i32
    %c0_i32_0 = arith.constant 0 : i32
    return %arg0, %c0_i32 : i32, i32
  }
  func.func @transform_1(%arg0: i32) -> (i32, i32) {
    %c0_i32 = arith.constant 0 : i32
    %c0_i32_0 = arith.constant 0 : i32
    return %arg0, %c0_i32 : i32, i32
  }
  func.func @transform_2(%arg0: i32) -> (i32, i32) {
    %c0_i32 = arith.constant 0 : i32
    %c0_i32_0 = arith.constant 0 : i32
    return %arg0, %c0_i32 : i32, i32
  }
  func.func @transform_3(%arg0: i32) -> (i32, i32) {
    %c0_i32 = arith.constant 0 : i32
    %c0_i32_0 = arith.constant 0 : i32
    %c0_i32_1 = arith.constant 0 : i32
    return %c0_i32, %c0_i32_0 : i32, i32
  }
  func.func @transform_4(%arg0: i32) -> (i32, i32) {
    %c0_i32 = arith.constant 0 : i32
    %c0_i32_0 = arith.constant 0 : i32
    %c0_i32_1 = arith.constant 0 : i32
    return %c0_i32, %c0_i32_0 : i32, i32
  }
  func.func @transform_5(%arg0: i32) -> (i32, i32) {
    %c0_i32 = arith.constant 0 : i32
    %c0_i32_0 = arith.constant 0 : i32
    %c0_i32_1 = arith.constant 0 : i32
    return %c0_i32, %c0_i32_0 : i32, i32
  }
  func.func @transform_6(%arg0: i32) -> (i32, i32) {
    %c0_i32 = arith.constant 0 : i32
    %c0_i32_0 = arith.constant 0 : i32
    return %arg0, %c0_i32 : i32, i32
  }
  func.func @transform_7(%arg0: i32) -> (i32, i32, i32) {
    %c0_i32 = arith.constant 0 : i32
    %c0_i32_0 = arith.constant 0 : i32
    %c0_i32_1 = arith.constant 0 : i32
    return %arg0, %c0_i32, %c0_i32_0 : i32, i32, i32
  }
}

</mosaic_0001>

<bundles_post_ra>
// kernel: tpu_custom_call.1
= control target key start
LH: loop header
LB: loop body
LE: loop exit
PB: predicated region body
PF: predicated region fallthrough
CT: control target
= control target key end

     0   :  { %13 = vsyncpa [#allocation3], 0  ;;  %v3648_v2 = vmov 0   ;;  %v3649_v3 = vmov 2   ;;  %v4885_v22 = vmov 0.0   ;;  %v3651_v28 = vmov 1   ;;  %s4877_s0 = inlined_call_operand.vmem [shape: f32[8,358], index: 0, kind: input, shape index: {}]   ;;  %s4878_s1 = inlined_call_operand.vmem [shape: f32[8,1], index: 1, kind: input, shape index: {}]   ;;  %s4879_s2 = inlined_call_operand.vmem [shape: s32[8,5], index: 2, kind: input, shape index: {}]   ;;  %s4880_s3 = inlined_call_operand.vmem [shape: f32[30,148], index: 3, kind: input, shape index: {}]   ;;  %s4881_s4 = inlined_call_operand.vmem [shape: f32[358,20], index: 4, kind: input, shape index: {}]   ;;  %s4882_s5 = inlined_call_operand.vmem [shape: f32[4,20], index: 5, kind: input, shape index: {}]   ;;  %s4883_s6 = inlined_call_operand.hbm [shape: f32[8,374], index: 6, kind: output, shape index: {0}]   ;;  %s4884_s7 = inlined_call_operand.hbm [shape: f32[1,1,8], index: 7, kind: output, shape index: {1}]  }
   0x1   :  { %v31_v0 = vld [vmem:[%s4879_s2] sm:$0xff]  ;;  %3589 = vset.pattern.permute.xlu0 %v3648_v2  ;;  %3591 = vset.pattern.permute.xlu1 %v3649_v3  ;;  %v671_v5 = vld [vmem:[%s4881_s4 + $0x88] sm:$0xff]  ;;  %v672_v12 = vld [vmem:[%s4881_s4 + $0x90] sm:$0xff]  ;;  %v3652_v34 = vmov 3  }
   0x2   :  { %v670_v1 = vld [vmem:[%s4881_s4 + $0x80] sm:$0xff]  ;;  %v47_v4 = vadd.s32 10, %v31_v0  ;;  %35 = vperm.xlu0 %3589, %v31_v0   ;;  %v40_v7 = vadd.s32 6, %v31_v0  ;;  %v767_v9 = vand.u32 4294901760, %v671_v5  ;;  %v655_v10 = vld [vmem:[%s4881_s4 + $0x8] sm:$0xff]  ;;  %v673_v14 = vld [vmem:[%s4881_s4 + $0x98] sm:$0xff]  ;;  %163 = vmatprep.mubr.f32.mxu0 %v4885_v22 }
   0x3   :  { %v654_v6 = vld [vmem:[%s4881_s4] sm:$0xff]  ;;  %v764_v8 = vand.u32 4294901760, %v670_v1  ;;  %v719_v13 = vand.u32 4294901760, %v655_v10  ;;  %v770_v15 = vand.u32 4294901760, %v672_v12  ;;  %v656_v16 = vld [vmem:[%s4881_s4 + $0x10] sm:$0xff]  ;;  %v657_v17 = vld [vmem:[%s4881_s4 + $0x18] sm:$0xff] }
   0x4   :  { %v716_v11 = vand.u32 4294901760, %v654_v6  ;;  %49 = vperm.xlu1 %3591, %v47_v4   ;;  %v54_v18 = vadd.s32 18, %v31_v0  ;;  %v674_v20 = vld [vmem:[%s4881_s4 + $0xa0] sm:$0xff]  ;;  %v675_v21 = vld [vmem:[%s4881_s4 + $0xa8] sm:$0xff]  ;;  %v773_v25 = vand.u32 4294901760, %v673_v14  ;;  %v722_v29 = vand.u32 4294901760, %v656_v16 }
   0x5   :  { %v3728_v19 = vpack.c.bf16 %v767_v9, %v764_v8  ;;  %v3737_v23 = vsub.f32 %v670_v1, %v764_v8  ;;  %v658_v26 = vld [vmem:[%s4881_s4 + $0x20] sm:$0xff]  ;;  %v659_v27 = vld [vmem:[%s4881_s4 + $0x28] sm:$0xff]  ;;  %v725_v30 = vand.u32 4294901760, %v657_v17  ;;  %v776_v31 = vand.u32 4294901760, %v674_v20  ;;  %v676_v33 = vld [vmem:[%s4881_s4 + $0xb0] sm:$0xff] }
   0x6   :  { %v3739_v24 = vpack.c.bf16 %v719_v13, %v716_v11  ;;  %3590 = vset.pattern.permute.xlu0 %v3651_v28  ;;  %v779_v32 = vand.u32 4294901760, %v675_v21  ;;  %v61_v35 = vadd.s32 23, %v31_v0  ;;  %v3751_v36 = vsub.f32 %v671_v5, %v767_v9  ;;  %v677_v39 = vld [vmem:[%s4881_s4 + $0xb8] sm:$0xff]  ;;  %v660_v40 = vld [vmem:[%s4881_s4 + $0x30] sm:$0xff]  ;;  %v678_v46 = vld [vmem:[%s4881_s4 + $0xc0] sm:$0xff] }
   0x7   :  { %4968 = vst [vmem:[#allocation8_spill] sm:$0xff] %v3728_v19  ;;  %3247 = vmatprep.subr.bf16.mxu1 %v3728_v19  ;;  %42 = vperm.xlu0 %3590, %v40_v7   ;;  %v3753_v37 = vsub.f32 %v654_v6, %v716_v11  ;;  %v3755_v38 = vpack.c.bf16 %v773_v25, %v770_v15  ;;  %v728_v43 = vand.u32 4294901760, %v658_v26  ;;  %v731_v44 = vand.u32 4294901760, %v659_v27  ;;  %v661_v45 = vld [vmem:[%s4881_s4 + $0x38] sm:$0xff]  ;;  %v679_v47 = vld [vmem:[%s4881_s4 + $0xc8] sm:$0xff]  ;;  %v662_v56 = vld [vmem:[%s4881_s4 + $0x40] sm:$0xff] }
   0x8   :  { %4969 = vst [vmem:[#allocation9_spill] sm:$0xff] %v3739_v24  ;;  %3592 = vset.pattern.permute.xlu1 %v3652_v34  ;;  %3249 = vmatpush3.bf16.msra.mxu1 %v3739_v24  ;;  %v3764_v41 = vsub.f32 %v655_v10, %v719_v13  ;;  %v3766_v42 = vpack.c.bf16 %v725_v30, %v722_v29  ;;  %v782_v51 = vand.u32 4294901760, %v676_v33  ;;  %v785_v55 = vand.u32 4294901760, %v677_v39  ;;  %v663_v57 = vld [vmem:[%s4881_s4 + $0x48] sm:$0xff]  ;;  %v680_v58 = vld [vmem:[%s4881_s4 + $0xd0] sm:$0xff]  ;;  %v681_v63 = vld [vmem:[%s4881_s4 + $0xd8] sm:$0xff] }
   0x9   :  { %4970 = vst [vmem:[#allocation10_spill] sm:$0xff] %v3755_v38  ;;  %56 = vperm.xlu1 %3592, %v54_v18   ;;  %3251 = vmatprep.subr.bf16.mxu1 %v3755_v38  ;;  %v3778_v48 = vsub.f32 %v672_v12, %v770_v15  ;;  %v3780_v49 = vsub.f32 %v673_v14, %v773_v25  ;;  %v734_v59 = vand.u32 4294901760, %v660_v40  ;;  %v737_v60 = vand.u32 4294901760, %v661_v45  ;;  %v664_v0 = vld [vmem:[%s4881_s4 + $0x50] sm:$0xff]  ;;  %v665_v6 = vld [vmem:[%s4881_s4 + $0x58] sm:$0xff]  ;;  %v682_v7 = vld [vmem:[%s4881_s4 + $0xe0] sm:$0xff] }
   0xa   :  { %4971 = vst [vmem:[#allocation11_spill] sm:$0xff] %v3766_v42  ;;  %v3782_v50 = vpack.c.bf16 %v779_v32, %v776_v31  ;;  %v3784_v52 = vsub.f32 %v656_v16, %v722_v29  ;;  %v3786_v53 = vsub.f32 %v657_v17, %v725_v30  ;;  %v3788_v54 = vsub.f32 %v674_v20, %v776_v31  ;;  %v28_v8 = vld [vmem:[%s4877_s0 + $0x8] sm:$0xff]  ;;  %v3833_v14 = vld [vmem:[%s4877_s0] sm:$0xff] }
   0xb   :  { %v788_v61 = vand.u32 4294901760, %v678_v46  ;;  %v791_v62 = vand.u32 4294901760, %v679_v47  ;;  %3594 = vset.pattern.permute.xlu0 %v3648_v2  ;;  %v3653_v1 = vmov 4   ;;  %v3807_v3 = vsub.f32 %v675_v21, %v779_v32  ;;  %v683_v13 = vld [vmem:[%s4881_s4 + $0xe8] sm:$0xff]  ;;  %635 = vst [vmem:[#allocation2 + $0x8] sm:$0xff] %v28_v8 }
   0xc   :  { %4972 = vst [vmem:[#allocation12_spill] sm:$0xff] %v3782_v50  ;;  %3253 = vmatpush3.bf16.msra.mxu1 %v3766_v42  ;;  %v3809_v4 = vpack.c.bf16 %v731_v44, %v728_v43  ;;  %v3811_v5 = vsub.f32 %v658_v26, %v728_v43  ;;  %v3823_v9 = vsub.f32 %v659_v27, %v731_v44  ;;  %v740_v11 = vand.u32 4294901760, %v662_v56 }
   0xd   :  { %3593 = vset.pattern.permute.xlu1 %v3653_v1  ;;  %3255 = vmatprep.subr.bf16.mxu1 %v3782_v50  ;;  %v3825_v10 = vpack.c.bf16 %v785_v55, %v782_v51  ;;  %v743_v12 = vand.u32 4294901760, %v663_v57 }
   0xe   :  { %4973 = vst [vmem:[#allocation13_spill] sm:$0xff] %v3809_v4  ;;  %63 = vperm.xlu1 %3593, %v61_v35  }
   0xf   :  { %4974 = vst [vmem:[#allocation14_spill] sm:$0xff] %v3825_v10 }
  0x10   :  { %14 = vsyncpa [#allocation5], 0  ;;  %v3835_v15 = vsub.f32 %v676_v33, %v782_v51  ;;  %v3837_v16 = vsub.f32 %v677_v39, %v785_v55  ;;  %v3839_v17 = vpack.c.bf16 %v737_v60, %v734_v59  ;;  %v3841_v18 = vsub.f32 %v660_v40, %v734_v59  ;;  %634 = vst [vmem:[#allocation2] sm:$0xff] %v3833_v14  ;;  %v666_v27 = vld [vmem:[%s4881_s4 + $0x60] sm:$0xff]  ;;  %v667_v28 = vld [vmem:[%s4881_s4 + $0x68] sm:$0xff]  ;;  %s3656_s16 = smov 1  }
  0x11   :  { %v3844_v20 = vsub.f32 %v661_v45, %v737_v60  ;;  %v3846_v21 = vpack.c.bf16 %v791_v62, %v788_v61  ;;  %v794_v25 = vand.u32 4294901760, %v680_v58  ;;  %v797_v26 = vand.u32 4294901760, %v681_v63  ;;  %3257 = vmatpush3.bf16.msra.mxu1 %v3809_v4  ;;  %v3897_v60 = vld [vmem:[%s4881_s4 + $0x70] sm:$0xff]  ;;  %s3657_s19 = smov 102  }
  0x12   :  { %4975 = vst [vmem:[#allocation15_spill] sm:$0xff] %v3839_v17  ;;  %v746_v29 = vand.u32 4294901760, %v664_v0  ;;  %v749_v30 = vand.u32 4294901760, %v665_v6  ;;  %v800_v31 = vand.u32 4294901760, %v682_v7  ;;  %v803_v32 = vand.u32 4294901760, %v683_v13  ;;  %3259 = vmatprep.subr.bf16.mxu1 %v3825_v10  ;;  %3595 = vset.pattern.permute.xlu1 %v3648_v2  ;;  %v3883_v2 = vld [vmem:[%s4881_s4 + $0xf8] sm:$0xff] }
  0x13   :  { %4976 = vst [vmem:[#allocation16_spill] sm:$0xff] %v3846_v21  ;;  %v3856_v33 = vsub.f32 %v678_v46, %v788_v61  ;;  %v3858_v34 = vsub.f32 %v679_v47, %v791_v62  ;;  %v3860_v35 = vpack.c.bf16 %v743_v12, %v740_v11  ;;  %v3863_v39 = vsub.f32 %v662_v56, %v740_v11  ;;  %v3878_v47 = vld [vmem:[%s4881_s4 + $0xf0] sm:$0xff]  ;;  %v3902_v61 = vld [vmem:[%s4881_s4 + $0x78] sm:$0xff] }
  0x14   :  { %v3865_v40 = vsub.f32 %v663_v57, %v743_v12  ;;  %v752_v43 = vand.u32 4294901760, %v666_v27  ;;  %v755_v44 = vand.u32 4294901760, %v667_v28  ;;  %v3867_v45 = vpack.c.bf16 %v797_v26, %v794_v25 }
  0x15   :  { %4977 = vst [vmem:[#allocation17_spill] sm:$0xff] %v3860_v35  ;;  %v3869_v51 = vsub.f32 %v680_v58, %v794_v25  ;;  %v3871_v55 = vsub.f32 %v681_v63, %v797_v26  ;;  %v3873_v46 = vpack.c.bf16 %v749_v30, %v746_v29  ;;  %3261 = vmatpush3.bf16.msra.mxu1 %v3839_v17  ;;  %v3907_v63 = vand.u32 4294901760, %v28_v8 }
  0x16   :  { %4978 = vst [vmem:[#allocation18_spill] sm:$0xff] %v3867_v45  ;;  %v3886_v56 = vsub.f32 %v664_v0, %v746_v29  ;;  %v3888_v57 = vsub.f32 %v665_v6, %v749_v30  ;;  %v3890_v58 = vpack.c.bf16 %v803_v32, %v800_v31  ;;  %v3892_v59 = vsub.f32 %v682_v7, %v800_v31 }
  0x17   :  { %4979 = vst [vmem:[#allocation19_spill] sm:$0xff] %v3873_v46  ;;  %3263 = vmatprep.subr.bf16.mxu1 %v3846_v21  ;;  %v3905_v62 = vsub.f32 %v683_v13, %v803_v32  ;;  %4981 = vst [vmem:[#allocation21_spill] sm:$0xff] %v3907_v63  ;;  %v4887_v0 = vand.u32 4294901760, %v3737_v23  ;;  %v4888_v1 = vand.u32 4294901760, %v3751_v36  ;;  %v3911_v6 = vpack.c.bf16 %v755_v44, %v752_v43 }
  0x18   :  { %4980 = vst [vmem:[#allocation20_spill] sm:$0xff] %v3890_v58  ;;  %v3913_v7 = vsub.f32 %v666_v27, %v752_v43  ;;  %v806_v11 = vand.u32 4294901760, %v3878_v47  ;;  %v3920_v13 = vsub.f32 %v28_v8, %v3907_v63  ;;  %v3930_v30 = vand.u32 4294901760, %v3833_v14 }
  0x19   :  { %4982 = vst [vmem:[#allocation22_spill] sm:$0xff] %v3911_v6  ;;  %v943_v29 = vsub.f32 %v3737_v23, %v4887_v0  ;;  %3265 = vmatpush3.bf16.msra.mxu1 %v3860_v35  ;;  %v950_v27 = vsub.f32 %v3751_v36, %v4888_v1  ;;  %v4891_v31 = vand.u32 4294901760, %v3753_v37  ;;  %v4892_v32 = vand.u32 4294901760, %v3764_v41 }
  0x1a   :  { %3267 = vmatprep.subr.bf16.mxu1 %v3867_v45  ;;  %v4895_v8 = vand.u32 4294901760, %v3920_v13  ;;  %v4900_v22 = vand.u32 4294901760, %v3778_v48  ;;  %v4901_v0 = vand.u32 4294901760, %v3780_v49  ;;  %v3940_v1 = vsub.f32 %v3833_v14, %v3930_v30 }
  0x1b   :  { %v944_v43 = vand.u32 4294901760, %v943_v29  ;;  %v951_v26 = vand.u32 4294901760, %v950_v27  ;;  %v831_v25 = vsub.f32 %v3753_v37, %v4891_v31  ;;  %v838_v12 = vsub.f32 %v3764_v41, %v4892_v32 }
  0x1c   :  { %4983 = vst [vmem:[#allocation23_spill] sm:$0xff] %v3940_v1  ;;  %v814_v29 = vsub.f32 %v3920_v13, %v4895_v8  ;;  %v957_v27 = vsub.f32 %v3778_v48, %v4900_v22  ;;  %v964_v14 = vsub.f32 %v3780_v49, %v4901_v0  ;;  %v3959_v31 = vsub.f32 %v667_v28, %v755_v44 }
  0x1d   :  { %3269 = vmatpush3.bf16.msra.mxu1 %v3873_v46  ;;  %v4984_v32 = vand.u32 4294901760, %v3883_v2  ;;  %v4986_v8 = vand.u32 4294901760, %v3897_v60  ;;  %v4987_v21 = vand.u32 4294901760, %v3902_v61  ;;  %v4910_v22 = vand.u32 4294901760, %v3940_v1 }
  0x1e   :  { %3271 = vmatprep.subr.bf16.mxu1 %v3890_v58  ;;  %v815_v0 = vand.u32 4294901760, %v814_v29  ;;  %v3278_v45 = vpack.c.bf16 %v951_v26, %v944_v43  ;;  %v832_v10 = vand.u32 4294901760, %v831_v25  ;;  %v4989_v28 = vand.u32 4294901760, %v3784_v52 }
  0x1f   :  { %v3963_v35 = vpack.c.bf16 %v4984_v32, %v806_v11  ;;  %v3969_v17 = vpack.c.bf16 %v4987_v21, %v4986_v8  ;;  %v839_v46 = vand.u32 4294901760, %v838_v12  ;;  %v958_v32 = vand.u32 4294901760, %v957_v27 }
  0x20   :  { %v845_v44 = vsub.f32 %v3784_v52, %v4989_v28  ;;  %v4912_v4 = vand.u32 4294901760, %v3786_v53  ;;  %v4911_v50 = vand.u32 4294901760, %v3788_v54  ;;  %816 = vmatprep.mubr.f32.mxu1 %v815_v0  ;;  %v820_v21 = vsub.f32 %v3940_v1, %v4910_v22 }
  0x21   :  { %4985 = vst [vmem:[#allocation24_spill] sm:$0xff] %v3963_v35  ;;  %4988 = vst [vmem:[#allocation25_spill] sm:$0xff] %v3969_v17  ;;  %v965_v8 = vand.u32 4294901760, %v964_v14  ;;  %v4917_v29 = vand.u32 4294901760, %v3807_v3  ;;  %v4918_v25 = vand.u32 4294901760, %v3811_v5  ;;  %3273 = vmatpush3.bf16.msra.mxu1 %v3911_v6  ;;  %v4921_v43 = vand.u32 4294901760, %v3823_v9 }
  0x22   :  { %v846_v26 = vand.u32 4294901760, %v845_v44  ;;  %v852_v12 = vsub.f32 %v3786_v53, %v4912_v4  ;;  %v971_v0 = vsub.f32 %v3788_v54, %v4911_v50  ;;  %3275 = vmatprep.subr.bf16.mxu1 %v3963_v35  ;;  %v4922_v28 = vand.u32 4294901760, %v3835_v15 }
  0x23   :  { %v978_v27 = vsub.f32 %v3807_v3, %v4917_v29  ;;  %v859_v14 = vsub.f32 %v3811_v5, %v4918_v25  ;;  %v4927_v44 = vand.u32 4294901760, %v3837_v16  ;;  %v4001_v22 = vsub.f32 %v3878_v47, %v806_v11 }
  0x24   :  { %v853_v50 = vand.u32 4294901760, %v852_v12  ;;  %v866_v4 = vsub.f32 %v3823_v9, %v4921_v43  ;;  %v4933_v35 = vand.u32 4294901760, %v3841_v18  ;;  %v821_v6 = vand.u32 4294901760, %v820_v21 }
  0x25   :  { %v3280_v29 = vpack.c.bf16 %v839_v46, %v832_v10  ;;  %v985_v25 = vsub.f32 %v3835_v15, %v4922_v28  ;;  %v992_v58 = vsub.f32 %v3837_v16, %v4927_v44  ;;  %3277 = vmatpush3.bf16.msra.mxu1 %v3969_v17  ;;  %v3282_v47 = vpack.c.bf16 %v965_v8, %v958_v32 }
  0x26   :  { %v972_v11 = vand.u32 4294901760, %v971_v0  ;;  %v873_v12 = vsub.f32 %v3841_v18, %v4933_v35  ;;  %v4932_v43 = vand.u32 4294901760, %v3844_v20  ;;  %3279 = vmatprep.subr.bf16.mxu1 %v3278_v45  ;;  %v3284_v10 = vpack.c.bf16 %v853_v50, %v846_v26 }
  0x27   :  { %v979_v46 = vand.u32 4294901760, %v978_v27  ;;  %v860_v21 = vand.u32 4294901760, %v859_v14  ;;  %v4931_v28 = vand.u32 4294901760, %v3856_v33  ;;  %v867_v42 = vand.u32 4294901760, %v866_v4 }
  0x28   :  { %v986_v38 = vand.u32 4294901760, %v985_v25  ;;  %v880_v44 = vsub.f32 %v3844_v20, %v4932_v43  ;;  %v4928_v32 = vand.u32 4294901760, %v3858_v34  ;;  %822 = vmatmul.mubr.f32.vlgmr.msra.gmra.mrb[0].mxu1 %v821_v6  ;;  %v993_v8 = vand.u32 4294901760, %v992_v58 }
  0x29   :  { %v999_v0 = vsub.f32 %v3856_v33, %v4931_v28  ;;  %v4929_v50 = vand.u32 4294901760, %v3863_v39  ;;  %v4930_v45 = vand.u32 4294901760, %v3865_v40  ;;  %3281 = vmatpush3.bf16.msra.mxu1 %v3280_v29  ;;  %v874_v26 = vand.u32 4294901760, %v873_v12  ;;  %1052 = vmatprep.mubr.f32.mxu1 %v3907_v63 }
  0x2a   :  { %v881_v4 = vand.u32 4294901760, %v880_v44  ;;  %v1006_v25 = vsub.f32 %v3858_v34, %v4928_v32  ;;  %v4940_v27 = vand.u32 4294901760, %v3869_v51  ;;  %3283 = vmatprep.subr.bf16.mxu1 %v3282_v47  ;;  %v3286_v58 = vpack.c.bf16 %v979_v46, %v972_v11 }
  0x2b   :  { %v887_v6 = vsub.f32 %v3863_v39, %v4929_v50  ;;  %v894_v29 = vsub.f32 %v3865_v40, %v4930_v45  ;;  %v4990_v44 = vand.u32 4294901760, %v3883_v2  ;;  %v4991_v32 = vand.u32 4294901760, %v3897_v60 }
  0x2c   :  { %v4993_v11 = vand.u32 4294901760, %v3902_v61  ;;  %v4936_v50 = vand.u32 4294901760, %v3886_v56  ;;  %v3288_v45 = vpack.c.bf16 %v867_v42, %v860_v21  ;;  %v3290_v28 = vpack.c.bf16 %v993_v8, %v986_v38 }
  0x2d   :  { %v4043_v12 = vsub.f32 %v3883_v2, %v4990_v44  ;;  %v4048_v47 = vsub.f32 %v3897_v60, %v4991_v32  ;;  %v1000_v43 = vand.u32 4294901760, %v999_v0  ;;  %v4935_v35 = vand.u32 4294901760, %v3888_v57  ;;  %3285 = vmatpush3.bf16.msra.mxu1 %v3284_v10 }
  0x2e   :  { %v4053_v46 = vsub.f32 %v3902_v61, %v4993_v11  ;;  %v3292_v2 = vpack.c.bf16 %v881_v4, %v874_v26  ;;  %v1007_v44 = vand.u32 4294901760, %v1006_v25  ;;  %v1013_v60 = vsub.f32 %v3869_v51, %v4940_v27  ;;  %3287 = vmatprep.subr.bf16.mxu1 %v3286_v58 }
  0x2f   :  { %4992 = vst [vmem:[#allocation26_spill] sm:$0xff] %v4048_v47  ;;  %v4934_v32 = vand.u32 4294901760, %v3892_v59  ;;  %v888_v14 = vand.u32 4294901760, %v887_v6  ;;  %v895_v61 = vand.u32 4294901760, %v894_v29  ;;  %v4995_v11 = vand.u32 4294901760, %v3871_v55 }
  0x30   :  { %4994 = vst [vmem:[#allocation27_spill] sm:$0xff] %v4053_v46  ;;  %v4937_v38 = vand.u32 4294901760, %v3905_v62  ;;  %v901_v10 = vsub.f32 %v3886_v56, %v4936_v50  ;;  %v908_v21 = vsub.f32 %v3888_v57, %v4935_v35  ;;  %v4938_v8 = vand.u32 4294901760, %v3913_v7 }
  0x31   :  { %v1020_v42 = vsub.f32 %v3871_v55, %v4995_v11  ;;  %v4939_v0 = vand.u32 4294901760, %v3959_v31  ;;  %v1027_v26 = vsub.f32 %v3892_v59, %v4934_v32  ;;  %v4945_v25 = vand.u32 4294901760, %v4001_v22  ;;  %3289 = vmatpush3.bf16.msra.mxu1 %v3288_v45 }
  0x32   :  { %v1034_v4 = vsub.f32 %v3905_v62, %v4937_v38  ;;  %v4946_v58 = vand.u32 4294901760, %v4043_v12  ;;  %v3294_v6 = vpack.c.bf16 %v1007_v44, %v1000_v43  ;;  %v915_v29 = vsub.f32 %v3913_v7, %v4938_v8  ;;  %3291 = vmatprep.subr.bf16.mxu1 %v3290_v28 }
  0x33   :  { %v922_v11 = vsub.f32 %v3959_v31, %v4939_v0  ;;  %v4947_v32 = vand.u32 4294901760, %v4048_v47  ;;  %v1014_v35 = vand.u32 4294901760, %v1013_v60  ;;  %v1021_v50 = vand.u32 4294901760, %v1020_v42 }
  0x34   :  { %v1041_v38 = vsub.f32 %v4001_v22, %v4945_v25  ;;  %v1048_v43 = vsub.f32 %v4043_v12, %v4946_v58  ;;  %v3296_v45 = vpack.c.bf16 %v895_v61, %v888_v14  ;;  %v902_v44 = vand.u32 4294901760, %v901_v10 }
  0x35   :  { %v929_v8 = vsub.f32 %v4048_v47, %v4947_v32  ;;  %v4948_v0 = vand.u32 4294901760, %v4053_v46  ;;  %v909_v27 = vand.u32 4294901760, %v908_v21  ;;  %v1028_v28 = vand.u32 4294901760, %v1027_v26  ;;  %3293 = vmatpush3.bf16.msra.mxu1 %v3292_v2  ;;  %v73_v32 = vld [vmem:[%s4880_s3 + $0x8] sm:$0xff] }
  0x36   :  { %v1035_v60 = vand.u32 4294901760, %v1034_v4  ;;  %v916_v42 = vand.u32 4294901760, %v915_v29  ;;  %v923_v63 = vand.u32 4294901760, %v922_v11  ;;  %v1042_v17 = vand.u32 4294901760, %v1041_v38  ;;  %3295 = vmatprep.subr.bf16.mxu1 %v3294_v6  ;;  %v75_v38 = vld [vmem:[%s4880_s3 + $0x18] sm:$0xff]  ;;  %v72_v4 = vld [vmem:[%s4880_s3] sm:$0xff] }
  0x37   :  { %v1049_v25 = vand.u32 4294901760, %v1048_v43  ;;  %v936_v58 = vsub.f32 %v4053_v46, %v4948_v0  ;;  %v3298_v14 = vpack.c.bf16 %v1021_v50, %v1014_v35  ;;  %v930_v61 = vand.u32 4294901760, %v929_v8  ;;  %v74_v35 = vld [vmem:[%s4880_s3 + $0x10] sm:$0xff]  ;;  %v77_v6 = vld [vmem:[%s4880_s3 + $0x28] sm:$0xff]  ;;  %v79_v29 = vld [vmem:[%s4880_s3 + $0x38] sm:$0x3f] }
  0x38   :  { %v3300_v21 = vpack.c.bf16 %v909_v27, %v902_v44  ;;  %v3302_v26 = vpack.c.bf16 %v1035_v60, %v1028_v28  ;;  %v3304_v50 = vpack.c.bf16 %v923_v63, %v916_v42  ;;  %v78_v11 = vld [vmem:[%s4880_s3 + $0x30] sm:$0x3f]  ;;  %v91_v43 = vand.u32 4294901760, %v73_v32  ;;  %v76_v60 = vld [vmem:[%s4880_s3 + $0x20] sm:$0xff] }
  0x39   :  { %v937_v10 = vand.u32 4294901760, %v936_v58  ;;  %3297 = vmatpush3.bf16.msra.mxu1 %v3296_v45  ;;  %v3306_v8 = vpack.c.bf16 %v1049_v25, %v1042_v17  ;;  %v95_v45 = vand.u32 4294901760, %v75_v38  ;;  %v93_v44 = vand.u32 4294901760, %v72_v4 }
  0x3a   :  { %3299 = vmatprep.subr.bf16.mxu1 %v3298_v14  ;;  %v97_v28 = vand.u32 4294901760, %v74_v35  ;;  %vm84_vm0 = vcmask 1045504   ;;  %v4135_v42 = vsub.f32 %v73_v32, %v91_v43  ;;  %v101_v24 = vand.u32 4294901760, %v76_v60 }
  0x3b   :  { %v3308_v17 = vpack.c.bf16 %v937_v10, %v930_v61  ;;  %v89_v14 = vsel %vm84_vm0, %v79_v29, 0  ;;  %v99_v61 = vand.u32 4294901760, %v77_v6  ;;  %v86_v10 = vsel %vm84_vm0, %v78_v11, 0 }
  0x3c   :  { %4996 = vst [vmem:[#allocation28_spill] sm:$0xff] %v4135_v42  ;;  %v4139_v0 = vpack.c.bf16 %v95_v45, %v91_v43  ;;  %v4141_v25 = vsub.f32 %v75_v38, %v95_v45  ;;  %v4143_v63 = vpack.c.bf16 %v97_v28, %v93_v44  ;;  %v4145_v58 = vsub.f32 %v72_v4, %v93_v44 }
  0x3d   :  { %3301 = vmatpush3.bf16.msra.mxu1 %v3300_v21  ;;  %v4147_v27 = vsub.f32 %v74_v35, %v97_v28  ;;  %v103_v2 = vand.u32 4294901760, %v89_v14  ;;  %v4149_v32 = vsub.f32 %v77_v6, %v99_v61  ;;  %v105_v29 = vand.u32 4294901760, %v86_v10 }
  0x3e   :  { %4997 = vst [vmem:[#allocation29_spill] sm:$0xff] %v4139_v0  ;;  %4998 = vst [vmem:[#allocation30_spill] sm:$0xff] %v4143_v63  ;;  %3303 = vmatprep.subr.bf16.mxu1 %v3302_v26  ;;  %3199 = vmatprep.subr.bf16.mxu0 %v4139_v0  ;;  %v177_v21 = vand.u32 4294901760, %v4135_v42  ;;  %v189_v11 = vand.u32 4294901760, %v4141_v25  ;;  %v183_v38 = vand.u32 4294901760, %v4145_v58  ;;  %v4160_v35 = vsub.f32 %v76_v60, %v101_v24 }
  0x3f   :  { %3201 = vmatpush1.bf16.msra.mxu0 %v4143_v63  ;;  %v4156_v4 = vpack.c.bf16 %v103_v2, %v99_v61  ;;  %v4158_v26 = vsub.f32 %v89_v14, %v103_v2  ;;  %v195_v6 = vand.u32 4294901760, %v4147_v27  ;;  %v4163_v43 = vpack.c.bf16 %v105_v29, %v101_v24 }
  0x40   :  { %v4165_v45 = vsub.f32 %v86_v10, %v105_v29  ;;  %v178_v44 = vsub.f32 %v4135_v42, %v177_v21  ;;  %v190_v28 = vsub.f32 %v4141_v25, %v189_v11  ;;  %v184_v61 = vsub.f32 %v4145_v58, %v183_v38 }
  0x41   :  { %4999 = vst [vmem:[#allocation31_spill] sm:$0xff] %v4156_v4  ;;  %3305 = vmatpush3.bf16.msra.mxu1 %v3304_v50  ;;  %5000 = vst [vmem:[#allocation32_spill] sm:$0xff] %v4163_v43  ;;  %3203 = vmatprep.subr.bf16.mxu0 %v4156_v4  ;;  %v196_v2 = vsub.f32 %v4147_v27, %v195_v6  ;;  %v201_v60 = vand.u32 4294901760, %v4149_v32  ;;  %v213_v14 = vand.u32 4294901760, %v4158_v26  ;;  %v207_v10 = vand.u32 4294901760, %v4160_v35 }
  0x42   :  { %3307 = vmatprep.subr.bf16.mxu1 %v3306_v8  ;;  %v179_v50 = vand.u32 4294901760, %v178_v44  ;;  %v191_v24 = vand.u32 4294901760, %v190_v28  ;;  %v219_v29 = vand.u32 4294901760, %v4165_v45  ;;  %v185_v63 = vand.u32 4294901760, %v184_v61 }
  0x43   :  { %3205 = vmatpush1.bf16.msra.mxu0 %v4163_v43  ;;  %v197_v8 = vand.u32 4294901760, %v196_v2  ;;  %v202_v4 = vsub.f32 %v4149_v32, %v201_v60  ;;  %v214_v0 = vsub.f32 %v4158_v26, %v213_v14  ;;  %v208_v19 = vsub.f32 %v4160_v35, %v207_v10 }
  0x44   :  { %v3206_v1 = vpack.c.bf16 %v191_v24, %v179_v50  ;;  %v220_v46 = vsub.f32 %v4165_v45, %v219_v29  ;;  %v5001_v28 = vpack.c.bf16 %v3751_v36, %v3737_v23  ;;  %v3216_v47 = vpack.c.bf16 %v4147_v27, %v4145_v58 }
  0x45   :  { %3309 = vmatpush3.bf16.msra.mxu1 %v3308_v17  ;;  %v4186_v43 = vpack.c.bf16 %v197_v8, %v185_v63  ;;  %v203_v61 = vand.u32 4294901760, %v202_v4  ;;  %v215_v2 = vand.u32 4294901760, %v214_v0  ;;  %v209_v17 = vand.u32 4294901760, %v208_v19 }
  0x46   :  { %3311 = vmatprep.subr.bf16.mxu1 %v5001_v28  ;;  %3207 = vmatprep.subr.bf16.mxu0 %v3206_v1  ;;  %v221_v50 = vand.u32 4294901760, %v220_v46  ;;  %v3218_v24 = vpack.c.bf16 %v4158_v26, %v4149_v32  ;;  %v3220_v44 = vpack.c.bf16 %v4165_v45, %v4160_v35  ;;  %v4197_v63 = vpack.c.bf16 %v189_v11, %v177_v21  ;;  %v4476_v32 = vld [vmem:[%s4881_s4 + $0x130] sm:$0xff]  ;;  %v4481_v26 = vld [vmem:[%s4881_s4 + $0x138] sm:$0xff] }
  0x47   :  { %v4195_v42 = vpack.c.bf16 %v215_v2, %v203_v61  ;;  %v4199_v4 = vpack.c.bf16 %v195_v6, %v183_v38  ;;  %v4201_v0 = vpack.c.bf16 %v213_v14, %v201_v60  ;;  %v5002_v19 = vpack.c.bf16 %v3764_v41, %v3753_v37 }
  0x48   :  { %1054 = vmatmul.mubr.f32.vlgmr.msra.gmra.mrb[2].mxu1 %v3930_v30  ;;  %v4207_v1 = vpack.c.bf16 %v221_v50, %v209_v17  ;;  %v4209_v46 = vpack.c.bf16 %v219_v29, %v207_v10  ;;  %v5003_v8 = vand.u32 4294901760, %v3737_v23  ;;  %v5004_v28 = vand.u32 4294901760, %v3751_v36 }
  0x49   :  { %3313 = vmatpush3.bf16.msra.mxu1 %v5002_v19  ;;  %1189 = vmatprep.mubr.f32.mxu1 %v3920_v13  ;;  %v5005_v11 = vpack.c.bf16 %v3780_v49, %v3778_v48  ;;  %v5006_v38 = vand.u32 4294901760, %v3753_v37  ;;  %v5007_v6 = vand.u32 4294901760, %v3764_v41  ;;  %v5008_v14 = vand.u32 4294901760, %v3778_v48 }
  0x4a   :  { %v4215_v21 = vpack.c.bf16 %v5004_v28, %v5003_v8  ;;  %v5009_v10 = vand.u32 4294901760, %v3780_v49  ;;  %v5010_v23 = vand.u32 4294901760, %v3784_v52  ;;  %v5011_v36 = vand.u32 4294901760, %v3786_v53 }
  0x4b   :  { %3315 = vmatprep.subr.bf16.mxu1 %v5005_v11  ;;  %v4224_v60 = vpack.c.bf16 %v5007_v6, %v5006_v38  ;;  %v5012_v2 = vand.u32 4294901760, %v3788_v54  ;;  %v5013_v37 = vand.u32 4294901760, %v3807_v3  ;;  %v5014_v41 = vand.u32 4294901760, %v3811_v5 }
  0x4c   :  { %v4230_v29 = vpack.c.bf16 %v5009_v10, %v5008_v14  ;;  %v4236_v61 = vpack.c.bf16 %v5011_v36, %v5010_v23  ;;  %v5015_v48 = vand.u32 4294901760, %v3823_v9  ;;  %v5016_v49 = vpack.c.bf16 %v3786_v53, %v3784_v52 }
  0x4d   :  { %v4242_v17 = vpack.c.bf16 %v5013_v37, %v5012_v2  ;;  %v3320_v19 = vpack.c.bf16 %v3823_v9, %v3811_v5  ;;  %v5017_v8 = vpack.c.bf16 %v3807_v3, %v3788_v54  ;;  %v3322_v28 = vpack.c.bf16 %v3837_v16, %v3835_v15 }
  0x4e   :  { %v4248_v50 = vpack.c.bf16 %v5015_v48, %v5014_v41  ;;  %3317 = vmatpush3.bf16.msra.mxu1 %v5016_v49  ;;  %v5018_v11 = vand.u32 4294901760, %v3835_v15  ;;  %v5019_v38 = vand.u32 4294901760, %v3837_v16  ;;  %v5020_v14 = vand.u32 4294901760, %v3841_v18 }
  0x4f   :  { %3319 = vmatprep.subr.bf16.mxu1 %v5017_v8  ;;  %v5021_v52 = vand.u32 4294901760, %v3844_v20  ;;  %v3324_v54 = vpack.c.bf16 %v3844_v20, %v3841_v18  ;;  %v3326_v3 = vpack.c.bf16 %v3858_v34, %v3856_v33  ;;  %v5022_v5 = vand.u32 4294901760, %v3856_v33 }
  0x50   :  { %v4264_v6 = vpack.c.bf16 %v5019_v38, %v5018_v11  ;;  %v5023_v9 = vand.u32 4294901760, %v3858_v34  ;;  %v5024_v16 = vand.u32 4294901760, %v3863_v39  ;;  %v5025_v10 = vand.u32 4294901760, %v3865_v40  ;;  %v5036_v11 = vld [vmem:[#allocation26_spill] sm:$0xff] }
  0x51   :  { %v4270_v53 = vpack.c.bf16 %v5021_v52, %v5020_v14  ;;  %v3328_v18 = vpack.c.bf16 %v3865_v40, %v3863_v39  ;;  %v3330_v20 = vpack.c.bf16 %v3871_v55, %v3869_v51  ;;  %v5026_v33 = vand.u32 4294901760, %v3869_v51  ;;  %v5038_v14 = vld [vmem:[#allocation27_spill] sm:$0xff] }
  0x52   :  { %3321 = vmatpush3.bf16.msra.mxu1 %v3320_v19  ;;  %v4280_v15 = vpack.c.bf16 %v5023_v9, %v5022_v5  ;;  %v4286_v23 = vpack.c.bf16 %v5025_v10, %v5024_v16  ;;  %v5027_v34 = vand.u32 4294901760, %v3871_v55  ;;  %v5028_v2 = vand.u32 4294901760, %v3886_v56  ;;  %v5042_v5 = vld [vmem:[#allocation9_spill] sm:$0xff]  ;;  %v5044_v16 = vld [vmem:[#allocation10_spill] sm:$0xff]  ;;  %v5045_v10 = vld [vmem:[#allocation11_spill] sm:$0xff] }
  0x53   :  { %3323 = vmatprep.subr.bf16.mxu1 %v3322_v28  ;;  %v5029_v37 = vand.u32 4294901760, %v3888_v57  ;;  %v3332_v39 = vpack.c.bf16 %v3888_v57, %v3886_v56  ;;  %v3334_v40 = vpack.c.bf16 %v3905_v62, %v3892_v59  ;;  %v5030_v51 = vand.u32 4294901760, %v3892_v59 }
  0x54   :  { %v4296_v36 = vpack.c.bf16 %v5027_v34, %v5026_v33  ;;  %v5031_v55 = vand.u32 4294901760, %v3905_v62  ;;  %v5032_v49 = vand.u32 4294901760, %v3913_v7  ;;  %v5033_v19 = vand.u32 4294901760, %v3959_v31  ;;  %v5048_v33 = vld [vmem:[#allocation14_spill] sm:$0xff]  ;;  %v5049_v34 = vld [vmem:[#allocation15_spill] sm:$0xff] }
  0x55   :  { %v4302_v41 = vpack.c.bf16 %v5029_v37, %v5028_v2  ;;  %v3336_v56 = vpack.c.bf16 %v3959_v31, %v3913_v7  ;;  %v3338_v57 = vpack.c.bf16 %v4043_v12, %v4001_v22  ;;  %v5034_v59 = vand.u32 4294901760, %v4001_v22  ;;  %v29_v7 = vld [vmem:[%s4877_s0 + $0x10] sm:$0xff]  ;;  %v5050_v2 = vld [vmem:[#allocation16_spill] sm:$0xff]  ;;  %v5051_v37 = vld [vmem:[#allocation17_spill] sm:$0xff] }
  0x56   :  { %3325 = vmatpush3.bf16.msra.mxu1 %v3324_v54  ;;  %v4312_v48 = vpack.c.bf16 %v5031_v55, %v5030_v51  ;;  %v4318_v8 = vpack.c.bf16 %v5033_v19, %v5032_v49  ;;  %v5035_v62 = vand.u32 4294901760, %v4043_v12  ;;  %v5037_v38 = vand.u32 4294901760, %v5036_v11  ;;  %v5040_v12 = vld [vmem:[#allocation8_spill] sm:$0xff]  ;;  %v5055_v55 = vld [vmem:[#allocation22_spill] sm:$0xff] }
  0x57   :  { %3327 = vmatprep.subr.bf16.mxu1 %v3326_v3  ;;  %v5039_v52 = vand.u32 4294901760, %v5038_v14  ;;  %vm636_vm1 = vcmask 834560   ;;  %v3340_v31 = vpack.c.bf16 %v5038_v14, %v5036_v11  ;;  %v5041_v3 = vld [vmem:[#allocation23_spill] sm:$0xff]  ;;  %v5043_v9 = vand.u32 4294901760, %v3920_v13  ;;  %v5054_v51 = vld [vmem:[#allocation20_spill] sm:$0xff] }
  0x58   :  { %v4328_v28 = vpack.c.bf16 %v5035_v62, %v5034_v59  ;;  %v4341_v22 = vsel %vm636_vm1, %v29_v7, 0  ;;  %637 = vst.msk [vmem:[#allocation2 + $0x10] sm:$0xff] %vm636_vm1, %v29_v7  ;;  %v5053_v13 = vld [vmem:[#allocation19_spill] sm:$0xff]  ;;  %v5057_v59 = vld [vmem:[#allocation25_spill] sm:$0xff]  ;;  %v5059_v14 = vmov 0.0   ;;  %vm80_vm7 = vcmask 244736  }
  0x59   :  { %v4334_v54 = vpack.c.bf16 %v5039_v52, %v5037_v38  ;;  %v5058_v38 = vand.u32 4294901760, %v5041_v3  ;;  %vm3655_vm8 = vmmov 0   ;;  %v1596_v45 = vand.u32 4294901760, %v4476_v32 }
  0x5a   :  { %3329 = vmatpush3.bf16.msra.mxu1 %v3328_v18  ;;  %v5046_v18 = vld [vmem:[#allocation12_spill] sm:$0xff]  ;;  %vm642_vm9 = vcmask 7168   ;;  %vm2191_vm10 = vcmask 162816   ;;  %vm648_vm11 = vcmask 966448  }
  0x5b   :  { %3331 = vmatprep.subr.bf16.mxu1 %v3330_v20  ;;  %v5047_v20 = vld [vmem:[#allocation13_spill] sm:$0xff] }
  0x5e   :  { %3333 = vmatpush3.bf16.msra.mxu1 %v3332_v39  ;;  %v5052_v39 = vld [vmem:[#allocation18_spill] sm:$0xff] }
  0x5f   :  { %3335 = vmatprep.subr.bf16.mxu1 %v3334_v40  ;;  %v32_v40 = vlaneseq }
  0x61   :  { %v33_v49 = vand.u32 127, %v32_v40 }
  0x62   :  { %3337 = vmatpush3.bf16.msra.mxu1 %v3336_v56  ;;  %v5056_v56 = vld [vmem:[#allocation24_spill] sm:$0xff] }
  0x63   :  { %3339 = vmatprep.subr.bf16.mxu1 %v3338_v57 }
  0x66   :  { %3341 = vmatpush3.bf16.msra.mxu1 %v3340_v31  ;;  %v5060_v31 = vld [vmem:[#allocation21_spill] sm:$0xff] }
  0x67   :  { %3343 = vmatprep.subr.bf16.mxu1 %v5040_v12 }
  0x69   :  { %1192 = vmatmul.mubr.f32.vlgmr.msra.gmra.mrb[4].mxu1 %v5041_v3 }
  0x6a   :  { %3345 = vmatpush3.bf16.msra.mxu1 %v5042_v5  ;;  %1296 = vmatprep.mubr.f32.mxu1 %v5043_v9 }
  0x6b   :  { %3347 = vmatprep.subr.bf16.mxu1 %v5044_v16 }
  0x6e   :  { %3349 = vmatpush3.bf16.msra.mxu1 %v5045_v10 }
  0x6f   :  { %3351 = vmatprep.subr.bf16.mxu1 %v5046_v18 }
  0x72   :  { %3353 = vmatpush3.bf16.msra.mxu1 %v5047_v20 }
  0x73   :  { %3355 = vmatprep.subr.bf16.mxu1 %v5048_v33 }
  0x76   :  { %3357 = vmatpush3.bf16.msra.mxu1 %v5049_v34 }
  0x77   :  { %3359 = vmatprep.subr.bf16.mxu1 %v5050_v2 }
  0x7a   :  { %3361 = vmatpush3.bf16.msra.mxu1 %v5051_v37 }
  0x7b   :  { %3363 = vmatprep.subr.bf16.mxu1 %v5052_v39 }
  0x7e   :  { %3365 = vmatpush3.bf16.msra.mxu1 %v5053_v13 }
  0x7f   :  { %3367 = vmatprep.subr.bf16.mxu1 %v5054_v51 }
  0x81   :  { %v36_v19 = vpop.permute.xlu0 %35 }
  0x82   :  { %3369 = vmatpush3.bf16.msra.mxu1 %v5055_v55  ;;  %vm37_vm2 = vcmp.eq.s32.totalorder %v33_v49, %v36_v19 }
  0x83   :  { %3371 = vmatprep.subr.bf16.mxu1 %v5056_v56  ;;  %v50_v57 = vpop.permute.xlu1 %49  ;;  %v2680_v52 = vsel %vm37_vm2, 1.0, %v5059_v14 }
  0x84   :  { %vm51_vm3 = vcmp.eq.s32.totalorder %v33_v49, %v50_v57 }
  0x85   :  { %v2682_v9 = vsel %vm51_vm3, 1.0, %v5059_v14 }
  0x86   :  { %3373 = vmatpush3.bf16.msra.mxu1 %v5057_v59  ;;  %v43_v62 = vpop.permute.xlu0 %42 }
  0x87   :  { %3407 = vmatprep.subr.bf16.mxu1 %v5040_v12  ;;  %vm44_vm4 = vcmp.eq.s32.totalorder %v33_v49, %v43_v62 }
  0x88   :  { %v57_v11 = vpop.permute.xlu1 %56  ;;  %v2681_v7 = vsel %vm44_vm4, 1.0, %v5059_v14 }
  0x89   :  { %1300 = vmatmul.mubr.f32.vlgmr.msra.gmra.mrb[6].mxu1 %v5058_v38  ;;  %vm58_vm5 = vcmp.eq.s32.totalorder %v33_v49, %v57_v11  ;;  %v68_v40 = vadd.f32 %v2681_v7, %v2680_v52  ;;  %v5064_v52 = vld [vmem:[#allocation30_spill] sm:$0xff]  ;;  %v4499_v7 = vld [vmem:[%s4881_s4 + $0x140] sm:$0xff] }
  0x8a   :  { %3409 = vmatpush3.bf16.msra.mxu1 %v5042_v5  ;;  %1570 = vmatprep.mubr.f32.mxu1 %v5060_v31  ;;  %v2683_v12 = vsel %vm58_vm5, 1.0, %v5059_v14 }
  0x8b   :  { %3411 = vmatprep.subr.bf16.mxu1 %v5044_v16  ;;  %v69_v19 = vadd.f32 %v2683_v12, %v2682_v9  ;;  %v4504_v9 = vld [vmem:[%s4881_s4 + $0x148] sm:$0xff]  ;;  %v5065_v12 = vld [vmem:[#allocation31_spill] sm:$0xff] }
  0x8d   :  { %v64_v57 = vpop.permute.xlu1 %63  ;;  %v70_v3 = vadd.f32 %v69_v19, %v68_v40  ;;  %v4507_v40 = vand.u32 4294901760, %v4341_v22 }
  0x8e   :  { %3413 = vmatpush3.bf16.msra.mxu1 %v5045_v10  ;;  %vm65_vm6 = vcmp.eq.s32.totalorder %v33_v49, %v64_v57  ;;  %v1602_v57 = vand.u32 4294901760, %v4499_v7 }
  0x8f   :  { %3415 = vmatprep.subr.bf16.mxu1 %v5046_v18  ;;  %v2684_v5 = vsel %vm65_vm6, 1.0, %v5059_v14 }
  0x90   :  { %v71_v62 = vadd.f32 %v2684_v5, %v70_v3  ;;  %v1605_v3 = vand.u32 4294901760, %v4504_v9  ;;  %v5066_v5 = vld [vmem:[#allocation32_spill] sm:$0xff] }
  0x92   :  { %3417 = vmatpush3.bf16.msra.mxu1 %v5047_v20  ;;  %v82_v11 = vsel %vm80_vm7, %v71_v62, 0  ;;  %v4525_v62 = vld [vmem:[%s4881_s4 + $0x150] sm:$0xff] }
  0x93   :  { %3419 = vmatprep.subr.bf16.mxu1 %v5048_v33  ;;  %v4377_v38 = vand.u32 4294901760, %v82_v11  ;;  %v4396_v33 = vld [vmem:[%s4881_s4 + $0x100] sm:$0xff] }
  0x95   :  { %v4380_v16 = vsub.f32 %v82_v11, %v4377_v38  ;;  %v4530_v11 = vld [vmem:[%s4881_s4 + $0x158] sm:$0xff] }
  0x96   :  { %3421 = vmatpush3.bf16.msra.mxu1 %v5049_v34  ;;  %v4401_v34 = vld [vmem:[%s4881_s4 + $0x108] sm:$0xff] }
  0x97   :  { %3423 = vmatprep.subr.bf16.mxu1 %v5050_v2  ;;  %v166_v10 = vand.u32 4294901760, %v4380_v16  ;;  %v4406_v2 = vld [vmem:[%s4878_s1] sm:$0xff] }
  0x98   :  { %701 = vperm.xlu0 %3594, %v4406_v2  }
  0x99   :  { %v167_v18 = vsub.f32 %v4380_v16, %v166_v10 }
  0x9a   :  { %3425 = vmatpush3.bf16.msra.mxu1 %v5051_v37  ;;  %v1581_v37 = vand.u32 4294901760, %v4401_v34 }
  0x9b   :  { %3427 = vmatprep.subr.bf16.mxu1 %v5052_v39  ;;  %v168_v20 = vand.u32 4294901760, %v167_v18  ;;  %v4419_v39 = vld [vmem:[%s4881_s4 + $0x110] sm:$0xff]  ;;  %v4534_v18 = vsub.f32 %v4341_v22, %v4507_v40  ;;  %v698_v22 = vld [vmem:[%s4881_s4 + $0x160] sm:$0x3f] }
  0x9d   :  { %169 = vmatmul.mubr.f32.vlgmr.msra.gmra.mrb[0].mxu0 %v168_v20  ;;  %v4544_v20 = vpack.c.bf16 %v1605_v3, %v1602_v57 }
  0x9e   :  { %3429 = vmatpush3.bf16.msra.mxu1 %v5053_v13  ;;  %3209 = vmatpush1.bf16.msra.mxu0 %v4186_v43  ;;  %v1578_v43 = vand.u32 4294901760, %v4396_v33  ;;  %v5061_v13 = vld [vmem:[#allocation28_spill] sm:$0xff] }
  0x9f   :  { %279 = vmatprep.mubr.f32.mxu0 %v5059_v14  ;;  %3211 = vmatprep.subr.bf16.mxu0 %v4195_v42  ;;  %v4424_v42 = vld [vmem:[%s4881_s4 + $0x118] sm:$0xff] }
  0xa0   :  { %3431 = vmatprep.subr.bf16.mxu1 %v5054_v51  ;;  %v5062_v51 = vpack.c.bf16 %v4141_v25, %v5061_v13  ;;  %v1587_v49 = vand.u32 4294901760, %v4424_v42  ;;  %v4446_v25 = vld [vmem:[%s4881_s4 + $0x120] sm:$0xff]  ;;  %v1608_v13 = vand.u32 4294901760, %v4525_v62 }
  0xa1   :  { %v1590_v27 = vand.u32 4294901760, %v4446_v25 }
  0xa2   :  { %3433 = vmatpush3.bf16.msra.mxu1 %v5055_v55  ;;  %3213 = vmatpush1.bf16.msra.mxu0 %v4207_v1  ;;  %v4435_v1 = vpack.c.bf16 %v1581_v37, %v1578_v43  ;;  %v1584_v55 = vand.u32 4294901760, %v4419_v39 }
  0xa3   :  { %3435 = vmatprep.subr.bf16.mxu1 %v5056_v56  ;;  %3215 = vmatprep.subr.bf16.mxu0 %v5062_v51  ;;  %v4451_v56 = vld [vmem:[%s4881_s4 + $0x128] sm:$0xff]  ;;  %v1611_v51 = vand.u32 4294901760, %v4530_v11 }
  0xa4   :  { %v1593_v58 = vand.u32 4294901760, %v4451_v56 }
  0xa5   :  { %281 = vmatmul.mubr.f32.vlgmr.msra.gmra.mrb[0].mxu0 %v4377_v38 }
  0xa6   :  { %3437 = vmatpush3.bf16.msra.mxu1 %v5057_v59  ;;  %3217 = vmatpush1.bf16.msra.mxu0 %v3216_v47  ;;  %v3654_v59 = vmov 0.0|0.0   ;;  %v4463_v47 = vpack.c.bf16 %v1587_v49, %v1584_v55  ;;  %v4490_v35 = vpack.c.bf16 %v1593_v58, %v1590_v27 }
  0xa7   :  { %367 = vmatprep.mubr.f32.mxu0 %v5059_v14  ;;  %3219 = vmatprep.subr.bf16.mxu0 %v3218_v24  ;;  %v5063_v24 = vld [vmem:[#allocation29_spill] sm:$0xff] }
  0xa8   :  { %3438 = vmatprep.subr.bf16.mxu1 %v3654_v59 }
  0xa9   :  { %1572 = vmatmul.mubr.f32.vlgmr.msra.gmra.mrb[8].mxu1 %v3930_v30 }
  0xaa   :  { %3440 = vmatpush3.bf16.msra.mxu1 %v4435_v1  ;;  %3020 = vmatprep.mubr.msk.f32.mxu1 %vm3655_vm8, %v5059_v14 }
  0xab   :  { %3221 = vmatpush1.bf16.msra.mxu0 %v3220_v44  ;;  %3441 = vmatprep.subr.bf16.mxu1 %v3654_v59  ;;  %v1599_v44 = vand.u32 4294901760, %v4481_v26 }
  0xac   :  { %3223 = vmatprep.subr.bf16.mxu0 %v5063_v24 }
  0xad   :  { %v4516_v19 = vpack.c.bf16 %v1599_v44, %v1596_v45 }
  0xae   :  { %370 = vmatmul.mubr.f32.vlgmr.msra.gmra.mrb[0].mxu0 %v4380_v16  ;;  %3443 = vmatpush3.bf16.msra.mxu1 %v4463_v47  ;;  %v4561_v16 = vpack.c.bf16 %v1611_v51, %v1608_v13 }
  0xaf   :  { %3225 = vmatpush1.bf16.msra.mxu0 %v5064_v52  ;;  %448 = vmatprep.mubr.f32.mxu0 %v5059_v14 }
  0xb0   :  { %3227 = vmatprep.subr.bf16.mxu0 %v5065_v12  ;;  %3444 = vmatprep.subr.bf16.mxu1 %v3654_v59 }
  0xb2   :  { %3446 = vmatpush3.bf16.msra.mxu1 %v4490_v35 }
  0xb3   :  { %3229 = vmatpush1.bf16.msra.mxu0 %v5066_v5  ;;  %3447 = vmatprep.subr.bf16.mxu1 %v3654_v59 }
  0xb4   :  { %3231 = vmatprep.subr.bf16.mxu0 %v4197_v63  ;;  %v1657_v63 = vand.u32 4294901760, %v4534_v18 }
  0xb6   :  { %452 = vmatmul.mubr.f32.vlgmr.msra.gmra.mrb[0].mxu0 %v166_v10  ;;  %3449 = vmatpush3.bf16.msra.mxu1 %v4516_v19 }
  0xb7   :  { %3233 = vmatpush1.bf16.msra.mxu0 %v4199_v4  ;;  %546 = vmatprep.mubr.f32.mxu0 %v5059_v14  ;;  %v4566_v4 = vsel %vm84_vm0, %v698_v22, 0 }
  0xb8   :  { %3235 = vmatprep.subr.bf16.mxu0 %v4201_v0  ;;  %3450 = vmatprep.subr.bf16.mxu1 %v3654_v59  ;;  %v1658_v0 = vsub.f32 %v4534_v18, %v1657_v63  ;;  %v4575_v10 = vand.u32 4294901760, %v4566_v4 }
  0xba   :  { %3452 = vmatpush3.bf16.msra.mxu1 %v4544_v20 }
  0xbb   :  { %3237 = vmatpush1.bf16.msra.mxu0 %v4209_v46  ;;  %3453 = vmatprep.subr.bf16.mxu1 %v3654_v59  ;;  %v1659_v46 = vand.u32 4294901760, %v1658_v0 }
  0xbc   :  { %3239 = vmatprep.subr.bf16.mxu0 %v5063_v24 }
  0xbe   :  { %548 = vmatmul.mubr.f32.vlgmr.msra.gmra.mrb[0].mxu0 %v4377_v38  ;;  %3455 = vmatpush3.bf16.msra.mxu1 %v4561_v16 }
  0xbf   :  { %3241 = vmatpush1.bf16.msra.mxu0 %v5064_v52  ;;  %626 = vmatprep.mubr.f32.mxu0 %v5059_v14 }
  0xc0   :  { %3243 = vmatprep.subr.bf16.mxu0 %v5065_v12  ;;  %3018 = vmatprep.subr.mxu1 %v5059_v14 }
  0xc2   :  { %3019 = vmatpush3.msra.mxu1 %v4575_v10 }
  0xc3   :  { %3245 = vmatpush1.bf16.msra.mxu0 %v5066_v5  ;;  %3021 = vmatmul.mubr.f32.vlgmr.msra.gmra.mrb[10].mxu1 %v1659_v46 }
  0xc4   :  { %3375 = vmatprep.subr.bf16.mxu0 %v4215_v21  ;;  %3168 = vmatprep.subr.mxu1 %v5059_v14  ;;  %v4599_v21 = vsub.f32 %v4396_v33, %v1578_v43 }
  0xc5   :  { %3170 = vmatprep.mubr.msk.f32.mxu1 %vm3655_vm8, %v5059_v14 }
  0xc6   :  { %628 = vmatmul.mubr.f32.vlgmr.msra.gmra.mrb[0].mxu0 %v4377_v38  ;;  %v4644_v38 = vsub.f32 %v4476_v32, %v1596_v45  ;;  %v4684_v32 = vsub.f32 %v4525_v62, %v1608_v13  ;;  %v4714_v13 = vsub.f32 %v4566_v4, %v4575_v10 }
  0xc7   :  { %3377 = vmatpush3.bf16.msra.mxu0 %v4224_v60  ;;  %1466 = vmatprep.mubr.f32.mxu0 %v5060_v31  ;;  %v4604_v60 = vsub.f32 %v4401_v34, %v1581_v37 }
  0xc8   :  { %3379 = vmatprep.subr.bf16.mxu0 %v4230_v29  ;;  %v4611_v29 = vsub.f32 %v4419_v39, %v1584_v55  ;;  %v1738_v62 = vand.u32 4294901760, %v4684_v32  ;;  %v1752_v4 = vand.u32 4294901760, %v4714_v13 }
  0xca   :  { %v1739_v46 = vsub.f32 %v4684_v32, %v1738_v62 }
  0xcb   :  { %3381 = vmatpush3.bf16.msra.mxu0 %v4236_v61  ;;  %v4616_v61 = vsub.f32 %v4424_v42, %v1587_v49  ;;  %v4664_v42 = vsub.f32 %v4499_v7, %v1602_v57  ;;  %v1710_v49 = vand.u32 4294901760, %v4644_v38 }
  0xcc   :  { %3383 = vmatprep.subr.bf16.mxu0 %v4242_v17  ;;  %v1668_v17 = vand.u32 4294901760, %v4599_v21 }
  0xcd   :  { %v1689_v31 = vand.u32 4294901760, %v4616_v61  ;;  %v1724_v7 = vand.u32 4294901760, %v4664_v42 }
  0xcf   :  { %3385 = vmatpush3.bf16.msra.mxu0 %v4248_v50  ;;  %v1675_v50 = vand.u32 4294901760, %v4604_v60  ;;  %v1690_v39 = vsub.f32 %v4616_v61, %v1689_v31 }
  0xd0   :  { %3387 = vmatprep.subr.bf16.mxu0 %v4264_v6  ;;  %v4624_v6 = vsub.f32 %v4446_v25, %v1590_v27 }
  0xd2   :  { %v1696_v33 = vand.u32 4294901760, %v4624_v6 }
  0xd3   :  { %3389 = vmatpush3.bf16.msra.mxu0 %v4270_v53  ;;  %v4629_v53 = vsub.f32 %v4451_v56, %v1593_v58  ;;  %v1691_v58 = vand.u32 4294901760, %v1690_v39  ;;  %v1753_v39 = vsub.f32 %v4714_v13, %v1752_v4 }
  0xd4   :  { %3391 = vmatprep.subr.bf16.mxu0 %v4280_v15  ;;  %v1669_v15 = vsub.f32 %v4599_v21, %v1668_v17 }
  0xd5   :  { %v1703_v34 = vand.u32 4294901760, %v4629_v53 }
  0xd6   :  { %v1670_v43 = vand.u32 4294901760, %v1669_v15 }
  0xd7   :  { %3393 = vmatpush3.bf16.msra.mxu0 %v4286_v23  ;;  %v1676_v23 = vsub.f32 %v4604_v60, %v1675_v50  ;;  %v1704_v55 = vsub.f32 %v4629_v53, %v1703_v34 }
  0xd8   :  { %3395 = vmatprep.subr.bf16.mxu0 %v4296_v36  ;;  %v1682_v36 = vand.u32 4294901760, %v4611_v29 }
  0xd9   :  { %v1677_v37 = vand.u32 4294901760, %v1676_v23  ;;  %v1705_v24 = vand.u32 4294901760, %v1704_v55  ;;  %v3475_v55 = vpack.c.bf16 %v4604_v60, %v4599_v21  ;;  %v3517_v21 = vpack.c.bf16 %v1703_v34, %v1696_v33 }
  0xdb   :  { %3397 = vmatpush3.bf16.msra.mxu0 %v4302_v41  ;;  %v4649_v41 = vsub.f32 %v4481_v26, %v1599_v44  ;;  %v3457_v56 = vpack.c.bf16 %v1677_v37, %v1670_v43  ;;  %v4696_v44 = vsub.f32 %v4530_v11, %v1611_v51  ;;  %v1740_v43 = vand.u32 4294901760, %v1739_v46 }
  0xdc   :  { %3399 = vmatprep.subr.bf16.mxu0 %v4312_v48  ;;  %v1683_v48 = vsub.f32 %v4611_v29, %v1682_v36  ;;  %v3511_v46 = vpack.c.bf16 %v1675_v50, %v1668_v17 }
  0xdd   :  { %v1717_v25 = vand.u32 4294901760, %v4649_v41  ;;  %v1745_v11 = vand.u32 4294901760, %v4696_v44 }
  0xde   :  { %v1684_v27 = vand.u32 4294901760, %v1683_v48 }
  0xdf   :  { %3401 = vmatpush3.bf16.msra.mxu0 %v4318_v8  ;;  %v1697_v8 = vsub.f32 %v4624_v6, %v1696_v33  ;;  %v1718_v45 = vsub.f32 %v4649_v41, %v1717_v25  ;;  %v1746_v15 = vsub.f32 %v4696_v44, %v1745_v11  ;;  %v3526_v50 = vpack.c.bf16 %v1745_v11, %v1738_v62 }
  0xe0   :  { %3403 = vmatprep.subr.bf16.mxu0 %v4328_v28  ;;  %v4678_v28 = vsub.f32 %v4504_v9, %v1605_v3  ;;  %v3460_v52 = vpack.c.bf16 %v1691_v58, %v1684_v27  ;;  %v1725_v3 = vsub.f32 %v4664_v42, %v1724_v7  ;;  %v3481_v27 = vpack.c.bf16 %v4629_v53, %v4624_v6 }
  0xe1   :  { %v1698_v26 = vand.u32 4294901760, %v1697_v8  ;;  %v1719_v57 = vand.u32 4294901760, %v1718_v45  ;;  %v1747_v37 = vand.u32 4294901760, %v1746_v15  ;;  %v1754_v8 = vand.u32 4294901760, %v1753_v39 }
  0xe2   :  { %v1726_v22 = vand.u32 4294901760, %v1725_v3  ;;  %v3484_v58 = vpack.c.bf16 %v4649_v41, %v4644_v38  ;;  %v3514_v15 = vpack.c.bf16 %v1689_v31, %v1682_v36 }
  0xe3   :  { %3405 = vmatpush3.bf16.msra.mxu0 %v4334_v54  ;;  %v1711_v54 = vsub.f32 %v4644_v38, %v1710_v49  ;;  %v3463_v9 = vpack.c.bf16 %v1705_v24, %v1698_v26  ;;  %v3472_v48 = vpack.c.bf16 %v1747_v37, %v1740_v43  ;;  %v3487_v26 = vpack.c.bf16 %v4678_v28, %v4664_v42 }
  0xe4   :  { %3456 = vmatprep.subr.bf16.mxu0 %v3654_v59  ;;  %v3490_v24 = vpack.c.bf16 %v4696_v44, %v4684_v32 }
  0xe5   :  { %v1712_v12 = vand.u32 4294901760, %v1711_v54 }
  0xe6   :  { %1468 = vmatmul.mubr.f32.vlgmr.msra.gmra.mrb[2].mxu0 %v3930_v30  ;;  %v1731_v30 = vand.u32 4294901760, %v4678_v28 }
  0xe7   :  { %3458 = vmatpush3.bf16.msra.mxu0 %v3457_v56  ;;  %3049 = vmatprep.mubr.msk.f32.mxu0 %vm3655_vm8, %v5059_v14  ;;  %v3466_v51 = vpack.c.bf16 %v1719_v57, %v1712_v12  ;;  %v3478_v56 = vpack.c.bf16 %v4616_v61, %v4611_v29  ;;  %v2685_v57 = vld [vmem:[%s4882_s5] ss:$0 sm:$0xff] }
  0xe8   :  { %3459 = vmatprep.subr.bf16.mxu0 %v3654_v59  ;;  %v1732_v5 = vsub.f32 %v4678_v28, %v1731_v30  ;;  %v3523_v17 = vpack.c.bf16 %v1731_v30, %v1724_v7  ;;  %v652_v28 = vld [vmem:[%s4882_s5 + $0x2] sm:$0x1] }
  0xe9   :  { %v2193_v32 = vsel %vm2191_vm10, %v652_v28, 0 }
  0xea   :  { %v1733_v0 = vand.u32 4294901760, %v1732_v5  ;;  %v2264_v44 = vand.u32 4294901760, %v2193_v32 }
  0xeb   :  { %3461 = vmatpush3.bf16.msra.mxu0 %v3460_v52 }
  0xec   :  { %3462 = vmatprep.subr.bf16.mxu0 %v3654_v59  ;;  %v3469_v23 = vpack.c.bf16 %v1733_v0, %v1726_v22  ;;  %v2265_v7 = vsub.f32 %v2193_v32, %v2264_v44 }
  0xee   :  { %v2266_v43 = vand.u32 4294901760, %v2265_v7 }
  0xef   :  { %3464 = vmatpush3.bf16.msra.mxu0 %v3463_v9 }
  0xf0   :  { %3465 = vmatprep.subr.bf16.mxu0 %v3654_v59 }
  0xf3   :  { %3467 = vmatpush3.bf16.msra.mxu0 %v3466_v51 }
  0xf4   :  { %3468 = vmatprep.subr.bf16.mxu0 %v3654_v59 }
  0xf7   :  { %3470 = vmatpush3.bf16.msra.mxu0 %v3469_v23 }
  0xf8   :  { %3471 = vmatprep.subr.bf16.mxu0 %v3654_v59 }
  0xfb   :  { %3473 = vmatpush3.bf16.msra.mxu0 %v3472_v48  ;;  %v2720_v54 = vpop.f32.mrb[0].mxu1 }
  0xfc   :  { %3047 = vmatprep.subr.mxu0 %v5059_v14  ;;  %v2721_v45 = vpop.f32.mrb[1].mxu1 }
  0xfd   :  { %v2722_v52 = vadd.f32 %v2721_v45, %v2720_v54 }
  0xff   :  { %3048 = vmatpush3.msra.mxu0 %v1754_v8 }
 0x100   :  { %3474 = vmatprep.subr.bf16.mxu0 %v3654_v59  ;;  %3050 = vmatmul.mubr.f32.vlgmr.msra.gmra.mrb[4].mxu0 %v4507_v40 }
 0x101   :  { %3476 = vmatpush3.bf16.msra.mxu0 %v3475_v55  ;;  %3078 = vmatprep.mubr.msk.f32.mxu0 %vm3655_vm8, %v5059_v14 }
 0x102   :  { %3477 = vmatprep.subr.bf16.mxu0 %v3654_v59 }
 0x105   :  { %3479 = vmatpush3.bf16.msra.mxu0 %v3478_v56 }
 0x106   :  { %3480 = vmatprep.subr.bf16.mxu0 %v3654_v59 }
 0x109   :  { %3482 = vmatpush3.bf16.msra.mxu0 %v3481_v27 }
 0x10a   :  { %3483 = vmatprep.subr.bf16.mxu0 %v3654_v59 }
 0x10d   :  { %3485 = vmatpush3.bf16.msra.mxu0 %v3484_v58 }
 0x10e   :  { %3486 = vmatprep.subr.bf16.mxu0 %v3654_v59 }
 0x111   :  { %3488 = vmatpush3.bf16.msra.mxu0 %v3487_v26 }
 0x112   :  { %3489 = vmatprep.subr.bf16.mxu0 %v3654_v59 }
 0x115   :  { %3491 = vmatpush3.bf16.msra.mxu0 %v3490_v24 }
 0x116   :  { %3076 = vmatprep.subr.mxu0 %v5059_v14 }
 0x117   :  { %v702_v5 = vpop.permute.xlu0 %701 }
 0x118   :  { %v708_v51 = vmul.f32 %v2685_v57, %v702_v5 }
 0x119   :  { %3077 = vmatpush3.msra.mxu0 %v4714_v13  ;;  %v2686_v13 = vld [vmem:[%s4882_s5 + $0x1] ss:$0 sm:$0xff] }
 0x11a   :  { %3492 = vmatprep.subr.bf16.mxu0 %v3654_v59  ;;  %3079 = vmatmul.mubr.f32.vlgmr.msra.gmra.mrb[4].mxu0 %v4534_v18  ;;  %v824_v22 = vadd.f32 %v2722_v52, %v708_v51 }
 0x11b   :  { %3494 = vmatpush3.bf16.msra.mxu0 %v4435_v1  ;;  %3107 = vmatprep.mubr.msk.f32.mxu0 %vm3655_vm8, %v5059_v14  ;;  %v2755_v9 = vpop.f32.mrb[2].mxu1 }
 0x11c   :  { %3495 = vmatprep.subr.bf16.mxu0 %v3654_v59  ;;  %v2756_v12 = vpop.f32.mrb[3].mxu1 }
 0x11d   :  { %v2757_v3 = vadd.f32 %v2756_v12, %v2755_v9 }
 0x11f   :  { %3497 = vmatpush3.bf16.msra.mxu0 %v4463_v47  ;;  %v1056_v0 = vadd.f32 %v2757_v3, %v824_v22 }
 0x120   :  { %3498 = vmatprep.subr.bf16.mxu0 %v3654_v59 }
 0x123   :  { %3500 = vmatpush3.bf16.msra.mxu0 %v4490_v35 }
 0x124   :  { %3501 = vmatprep.subr.bf16.mxu0 %v3654_v59 }
 0x127   :  { %3503 = vmatpush3.bf16.msra.mxu0 %v4516_v19 }
 0x128   :  { %3504 = vmatprep.subr.bf16.mxu0 %v3654_v59 }
 0x12b   :  { %3506 = vmatpush3.bf16.msra.mxu0 %v4544_v20 }
 0x12c   :  { %3507 = vmatprep.subr.bf16.mxu0 %v3654_v59 }
 0x12f   :  { %3509 = vmatpush3.bf16.msra.mxu0 %v4561_v16 }
 0x130   :  { %3105 = vmatprep.subr.mxu0 %v5059_v14 }
 0x133   :  { %3106 = vmatpush3.msra.mxu0 %v4575_v10 }
 0x134   :  { %3510 = vmatprep.subr.bf16.mxu0 %v3654_v59  ;;  %3108 = vmatmul.mubr.f32.vlgmr.msra.gmra.mrb[4].mxu0 %v1657_v63  ;;  %v3520_v63 = vpack.c.bf16 %v1717_v25, %v1710_v49 }
 0x135   :  { %3512 = vmatpush3.bf16.msra.mxu0 %v3511_v46  ;;  %3136 = vmatprep.mubr.msk.f32.mxu0 %vm3655_vm8, %v5059_v14 }
 0x136   :  { %3513 = vmatprep.subr.bf16.mxu0 %v3654_v59 }
 0x139   :  { %3515 = vmatpush3.bf16.msra.mxu0 %v3514_v15 }
 0x13a   :  { %3516 = vmatprep.subr.bf16.mxu0 %v3654_v59 }
 0x13c   :  { %v2790_v18 = vpop.f32.mrb[4].mxu1 }
 0x13d   :  { %3518 = vmatpush3.bf16.msra.mxu0 %v3517_v21  ;;  %v2791_v60 = vpop.f32.mrb[5].mxu1 }
 0x13e   :  { %3519 = vmatprep.subr.bf16.mxu0 %v3654_v59  ;;  %v2792_v29 = vadd.f32 %v2791_v60, %v2790_v18 }
 0x140   :  { %v1194_v61 = vadd.f32 %v2792_v29, %v1056_v0 }
 0x141   :  { %3521 = vmatpush3.bf16.msra.mxu0 %v3520_v63 }
 0x142   :  { %3522 = vmatprep.subr.bf16.mxu0 %v3654_v59 }
 0x145   :  { %3524 = vmatpush3.bf16.msra.mxu0 %v3523_v17 }
 0x146   :  { %3525 = vmatprep.subr.bf16.mxu0 %v3654_v59 }
 0x149   :  { %3527 = vmatpush3.bf16.msra.mxu0 %v3526_v50 }
 0x14a   :  { %3134 = vmatprep.subr.mxu0 %v5059_v14 }
 0x14d   :  { %3135 = vmatpush3.msra.mxu0 %v1752_v4  ;;  %v2267_v4 = vsub.f32 %v2265_v7, %v2266_v43 }
 0x14e   :  { %3528 = vmatprep.subr.bf16.mxu0 %v3654_v59  ;;  %3137 = vmatmul.mubr.f32.vlgmr.msra.gmra.mrb[4].mxu0 %v4507_v40 }
 0x14f   :  { %3530 = vmatpush3.bf16.msra.mxu0 %v4435_v1  ;;  %3165 = vmatprep.mubr.msk.f32.mxu0 %vm3655_vm8, %v5059_v14  ;;  %v2268_v8 = vand.u32 4294901760, %v2267_v4 }
 0x150   :  { %3531 = vmatprep.subr.bf16.mxu0 %v3654_v59 }
 0x153   :  { %3533 = vmatpush3.bf16.msra.mxu0 %v4463_v47 }
 0x154   :  { %3534 = vmatprep.subr.bf16.mxu0 %v3654_v59 }
 0x157   :  { %3536 = vmatpush3.bf16.msra.mxu0 %v4490_v35 }
 0x158   :  { %3537 = vmatprep.subr.bf16.mxu0 %v3654_v59 }
 0x15b   :  { %3539 = vmatpush3.bf16.msra.mxu0 %v4516_v19 }
 0x15c   :  { %3540 = vmatprep.subr.bf16.mxu0 %v3654_v59  ;;  %v2825_v6 = vpop.f32.mrb[6].mxu1 }
 0x15d   :  { %v2826_v53 = vpop.f32.mrb[7].mxu1 }
 0x15e   :  { %v2827_v1 = vadd.f32 %v2826_v53, %v2825_v6 }
 0x15f   :  { %3542 = vmatpush3.bf16.msra.mxu0 %v4544_v20 }
 0x160   :  { %3543 = vmatprep.subr.bf16.mxu0 %v3654_v59  ;;  %v1302_v36 = vadd.f32 %v2827_v1, %v1194_v61 }
 0x163   :  { %3545 = vmatpush3.bf16.msra.mxu0 %v4561_v16 }
 0x164   :  { %3163 = vmatprep.subr.mxu0 %v5059_v14 }
 0x167   :  { %3164 = vmatpush3.msra.mxu0 %v4575_v10  ;;  %v653_v10 = vld [vmem:[%s4882_s5 + $0x3] sm:$0x1]  ;;  %s3658_s5 = smov [#allocation2]  }
 0x168   :  { %3166 = vmatmul.mubr.f32.vlgmr.msra.gmra.mrb[4].mxu0 %v4507_v40  ;;  %s2658_s23 = sshll.u32 %s3658_s5, 4  ;;  %s2659_s23 = int_to_ptr.vmem [resolvable:$true] %s2658_s23 }
 0x169   :  { %s3600_s24 = scalar_lea.vmem %s2659_s23, 384  ;;  %p3605_p1 = scmp.lt.s32.totalorder %s2659_s23, %s2659_s23 }
 0x16a   :  { %p3601_p0 = scmp.ne.s32.totalorder %s2659_s23, %s3600_s24  ;;  %p3606_p2 = scmp.lt.s32.totalorder %s3600_s24, %s3600_s24 }
 0x16c   :  { %p3607_p3 = por %p3606_p2, %p3605_p1 }
 0x16e   :  { %p3608_p4 = pnand %p3607_p3, %p3601_p0 }
 0x17c   :  { %v2895_v47 = vpop.f32.mrb[8].mxu1 }
 0x17d   :  { %v2896_v35 = vpop.f32.mrb[9].mxu1 }
 0x17e   :  { %v2897_v19 = vadd.f32 %v2896_v35, %v2895_v47 }
 0x196   :  { %v1661_v31 = vpop.f32.mrb[10].mxu1 }
 0x197   :  { %v3022_v38 = vpop.f32.mrb[11].mxu1 }
 0x199   :  { %v629_v41 = vpop.f32.mrb[0].mxu0 }
 0x19a   :  { %639 = vrot.lane.b32.xlu1 %v629_v41, %s3656_s16  ;;  %v631_v20 = vpop.f32.mrb[1].mxu0 }
 0x19e   :  { %2188 = vperm.xlu1 %3595, %v653_v10  }
 0x1b9   :  { %v2860_v33 = vpop.f32.mrb[2].mxu0 }
 0x1ba   :  { %v2861_v59 = vpop.f32.mrb[3].mxu0 }
 0x1bb   :  { %v2862_v34 = vadd.f32 %v2861_v59, %v2860_v33 }
 0x1bd   :  { %v1470_v42 = vadd.f32 %v2862_v34, %v1302_v36 }
 0x1bf   :  { %v1574_v16 = vadd.f32 %v2897_v19, %v1470_v42 }
 0x1c1   :  { %v1662_v49 = vadd.f32 %v1661_v31, %v1574_v16 }
 0x20c   :  { %v640_v40 = vpop.permute.xlu1 %639 }
 0x20d   :  { %v643_v25 = vsel %vm642_vm9, %v4406_v2, %v640_v40 }
 0x20e   :  { %645 = vrot.lane.b32.xlu0 %v643_v25, %s3657_s19 }
 0x23b   :  { %v2175_v30 = vpop.f32.mrb[4].mxu0 }
 0x23c   :  { %v3547_v62 = vadd.f32 %v2175_v30, %v1662_v49  ;;  %v3167_v11 = vpop.f32.mrb[5].mxu0 }
 0x23e   :  { %v2179_v23 = vadd.f32 %v3547_v62, %v631_v20 }
 0x240   :  { %v2184_v2 = vadd.f32 %v2686_v13, %v2179_v23 }
 0x242   :  { %v2185_v37 = vmax.f32 %v2184_v2, 0.0 }
 0x244   :  { %v2196_v48 = vsel %vm2191_vm10, %v2185_v37, 0 }
 0x245   :  { %v2199_v39 = vand.u32 4294901760, %v2196_v48 }
 0x247   :  { %3169 = vmatpush3.xpose.msra.mxu1 %v2199_v39  ;;  %v2276_v55 = vsub.f32 %v2196_v48, %v2199_v39 }
 0x248   :  { %3173 = vmatprep.subr.mxu1 %v5059_v14 }
 0x249   :  { %v2277_v56 = vand.u32 4294901760, %v2276_v55 }
 0x24a   :  { %3171 = vmatmul.mubr.f32.vlgmr.msra.gmra.mrb[12].mxu1 %v2268_v8 }
 0x24b   :  { %v2278_v27 = vsub.f32 %v2276_v55, %v2277_v56  ;;  %3175 = vmatprep.mubr.msk.f32.mxu1 %vm3655_vm8, %v5059_v14 }
 0x24d   :  { %v2279_v58 = vand.u32 4294901760, %v2278_v27 }
 0x24f   :  { %3174 = vmatpush3.xpose.msra.mxu1 %v2279_v58 }
 0x250   :  { %3178 = vmatprep.subr.mxu1 %v5059_v14 }
 0x252   :  { %3176 = vmatmul.mubr.f32.vlgmr.msra.gmra.mrb[12].mxu1 %v2264_v44 }
 0x253   :  { %3179 = vmatpush3.xpose.msra.mxu1 %v2276_v55  ;;  %3180 = vmatprep.mubr.msk.f32.mxu1 %vm3655_vm8, %v5059_v14 }
 0x254   :  { %3183 = vmatprep.subr.mxu1 %v5059_v14 }
 0x25a   :  { %3181 = vmatmul.mubr.f32.vlgmr.msra.gmra.mrb[12].mxu1 %v2265_v7 }
 0x25b   :  { %3184 = vmatpush3.xpose.msra.mxu1 %v2199_v39  ;;  %3185 = vmatprep.mubr.msk.f32.mxu1 %vm3655_vm8, %v5059_v14 }
 0x25c   :  { %3188 = vmatprep.subr.mxu1 %v5059_v14 }
 0x262   :  { %3186 = vmatmul.mubr.f32.vlgmr.msra.gmra.mrb[12].mxu1 %v2266_v43 }
 0x263   :  { %3189 = vmatpush3.xpose.msra.mxu1 %v2277_v56  ;;  %3190 = vmatprep.mubr.msk.f32.mxu1 %vm3655_vm8, %v5059_v14 }
 0x264   :  { %3193 = vmatprep.subr.mxu1 %v5059_v14 }
 0x26a   :  { %3191 = vmatmul.mubr.f32.vlgmr.msra.gmra.mrb[12].mxu1 %v2264_v44 }
 0x26b   :  { %3194 = vmatpush3.xpose.msra.mxu1 %v2199_v39  ;;  %3195 = vmatprep.mubr.msk.f32.mxu1 %vm3655_vm8, %v5059_v14 }
 0x272   :  { %3196 = vmatmul.mubr.f32.vlgmr.msra.gmra.mrb[12].mxu1 %v2264_v44 }
 0x280   :  { %v646_v26 = vpop.permute.xlu0 %645 }
 0x281   :  { %649 = vst.msk [vmem:[#allocation2 + $0x10] sm:$0xff] %vm648_vm11, %v646_v26 }
 0x282   :  { %3611 = shalt.err (!%p3608_p4)
}
 0x283   :  { %s3612_s27 = scalar_lea.hbm %s4883_s6, 384 }
 0x284   :  { %p3613_p5 = scmp.ne.s32.totalorder %s4883_s6, %s3612_s27  ;;  %p3616_p6 = scmp.lt.u32.totalorder %s3612_s27, %s4883_s6 }
 0x286   :  { %p3618_p7 = pnand %p3616_p6, %p3613_p5 }
 0x288   :  { %3621 = shalt.err (!%p3618_p7)
}
 0x289   :  { %2661 = dma.vmem_to_hbm [thread:$0]  %s2659_s23, 384, %s4883_s6, [#allocation3]   ;;  %v2189_v14 = vpop.permute.xlu1 %2188  ;;  %vm2650_vm12 = vcmask 57344  }
 0x28a   :  { %s3659_s10 = smov [#allocation4]  }
 0x28b   :  { %s2668_s11 = sshll.u32 %s3659_s10, 4  ;;  %s2669_s11 = int_to_ptr.vmem [resolvable:$true] %s2668_s11 }
 0x28c   :  { %s3622_s12 = scalar_lea.vmem %s2669_s11, 16  ;;  %s3626_s13 = scalar_lea.vmem %s2669_s11, 32 }
 0x28d   :  { %p3623_p8 = scmp.ne.s32.totalorder %s2669_s11, %s3622_s12  ;;  %p3627_p9 = scmp.lt.s32.totalorder %s2669_s11, %s2669_s11 }
 0x28e   :  { %p3628_p10 = scmp.lt.s32.totalorder %s3626_s13, %s3622_s12 }
 0x290   :  { %p3629_p11 = por %p3628_p10, %p3627_p9 }
 0x292   :  { %p3630_p12 = pnand %p3629_p11, %p3623_p8 }
 0x345   :  { %v2640_v24 = vpop.f32.mrb[12].mxu1 }
 0x346   :  { %v3548_v54 = vadd.f32 %v2640_v24, %v2189_v14  ;;  %v3197_v45 = vpop.f32.mrb[13].mxu1 }
 0x348   :  { %v2687_v52 = vmul.f32 -1.442695, %v3548_v54 }
 0x34a   :  { %3596 = vpow2.f32 %v2687_v52 }
 0x354   :  { %v3597_v9 = vpop.eup %3596 }
 0x355   :  { %v2647_v12 = vadd.f32 1.0, %v3597_v9 }
 0x357   :  { %3598 = vrcp.f32 %v2647_v12 }
 0x361   :  { %v3599_v57 = vpop.eup %3598 }
 0x362   :  { %2651 = vst.msk [vmem:[#allocation4] sm:$0x1] %vm2650_vm12, %v3599_v57 }
 0x363   :  { %3633 = shalt.err (!%p3630_p12)
}
 0x364   :  { %s3634_s14 = scalar_lea.hbm %s4884_s7, 16 }
 0x365   :  { %p3635_p13 = scmp.ne.s32.totalorder %s4884_s7, %s3634_s14  ;;  %p3638_p0 = scmp.lt.u32.totalorder %s3634_s14, %s4884_s7 }
 0x367   :  { %p3640_p1 = pnand %p3638_p0, %p3635_p13 }
 0x369   :  { %3643 = shalt.err (!%p3640_p1)
}
 0x36a   :  { %2671 = dma.vmem_to_hbm [thread:$0]  %s2669_s11, 16, %s4884_s7, [#allocation5]  }
 0x36b   :  { %3644 = dma.done.wait [#allocation3], 384  }
 0x36c   :  { %3645 = vsyncadd [#allocation3], 4294966912 }
 0x36d   :  { %3646 = dma.done.wait [#allocation5], 16  }
 0x36e   :  { %3647 = vsyncadd [#allocation5], 4294967280 }
 0x36f   :  { %2678 = vsyncpa [#allocation3], 1 }
 0x370   :  { %2679 = vsyncpa [#allocation5], 1 }

</bundles_post_ra>
